<compile_context>
chip_gen: v7x
topology: tpu7x:2x2x1
jax: 0.10.0
libtpu: 0.0.40
codegen_flags: <defaults>
</compile_context>

<pallas_src>
import jax
import jax.numpy as jnp
from jax.experimental import pallas as pl
from jax.experimental.pallas import tpu as pltpu

BN_EPS = 0.001     # matches nn.BatchNorm1d(..., eps=0.001)
F = 128            # padded (lane-dense) weight width
N_LAYERS = 10      # 5 encoder + 5 decoder Linear layers
Z_DIM = 8          # latent width


def _make_aenet_kernel(input_dim, n_rows):
    """Build the whole-AENet forward kernel for static (input_dim, N)."""
    inv_n = 1.0 / float(n_rows)   # static, folded at trace time

    def kernel(x_ref, w_ref, gb_ref, recon_ref, z_ref):
        """
        x_ref:     (N, input_dim)   bf16  input (no padding)
        w_ref:     (10, 128, 128)   bf16  all Linear weights, zero-padded
        gb_ref:    (10, 2, 128)     f32   layers 0-8: (gamma, beta);
                                          layer 9:    (final bias, zeros)
        recon_ref: (N, input_dim)   f32   decoder output
        z_ref:     (N, 8)           f32   latent (post BN+ReLU, as in torch)
        """
        h = x_ref[...]                       # bf16 activations feed the MXU
        for layer in range(N_LAYERS):        # static unroll
            if layer == 0:
                W = w_ref[0, :input_dim, :]  # K = input_dim, skip padded rows
            else:
                W = w_ref[layer]             # (128, 128) bf16

            # Linear on the MXU, f32 accumulation.  Bias omitted for layers
            # 0..8: it cancels exactly under training-mode BN's mean subtract.
            h32 = jnp.dot(h, W, preferred_element_type=jnp.float32)

            if layer < N_LAYERS - 1:
                g = gb_ref[layer, 0:1, :]    # (1,128) f32 gamma
                be = gb_ref[layer, 1:2, :]   # (1,128) f32 beta
                # One-pass batch statistics: two independent reductions.
                mean = jnp.sum(h32, axis=0, keepdims=True) * inv_n
                mean_sq = jnp.sum(h32 * h32, axis=0, keepdims=True) * inv_n
                var = mean_sq - mean * mean
                scale = g * jax.lax.rsqrt(var + BN_EPS)      # rsqrt -> EUP
                shift = be - mean * scale
                h32 = jnp.maximum(h32 * scale + shift, 0.0)  # fused BN + ReLU
                if layer == 4:               # end of encoder -> latent z
                    z_ref[...] = h32[:, :Z_DIM]
                h = h32.astype(jnp.bfloat16)
            else:
                b = gb_ref[layer, 0:1, :]    # final decoder Linear bias
                recon_ref[...] = (h32 + b)[:, :input_dim]

    return kernel


def _init_params(key, input_dim):
    """Torch-equivalent parameters (nn.Linear default init; BN gamma=1, beta=0)."""
    dims = [
        (input_dim, 128), (128, 128), (128, 128), (128, 128), (128, Z_DIM),  # encoder
        (Z_DIM, 128), (128, 128), (128, 128), (128, 128), (128, input_dim),  # decoder
    ]
    layers = []
    for i, (din, dout) in enumerate(dims):
        key, k_w, k_b = jax.random.split(key, 3)
        bound = 1.0 / jnp.sqrt(jnp.float32(din))
        W = jax.random.uniform(k_w, (din, dout), jnp.float32, -bound, bound)
        b = jax.random.uniform(k_b, (dout,), jnp.float32, -bound, bound)
        if i != len(dims) - 1:   # every Linear except the last is followed by BN
            g = jnp.ones((dout,), jnp.float32)
            be = jnp.zeros((dout,), jnp.float32)
        else:
            g, be = None, None
        layers.append((W, b, g, be))
    return layers


def _pack_params(layers):
    """Pack per-layer params into 2 stacked arrays (3 DMAs total incl. x).

    Biases of BN-followed layers are NOT shipped (they cancel in the kernel).
    """
    w_stack, gb_stack = [], []
    for i, (W, b, g, be) in enumerate(layers):
        din, dout = W.shape
        Wp = jnp.zeros((F, F), jnp.float32).at[:din, :dout].set(W)
        w_stack.append(Wp)
        if i != N_LAYERS - 1:
            gp = jnp.zeros((F,), jnp.float32).at[:dout].set(g)
            bep = jnp.zeros((F,), jnp.float32).at[:dout].set(be)
            gb_stack.append(jnp.stack([gp, bep], axis=0))
        else:
            bp = jnp.zeros((F,), jnp.float32).at[:dout].set(b)
            gb_stack.append(jnp.stack([bp, jnp.zeros((F,), jnp.float32)], axis=0))
    # Weights in bf16 for full-rate MXU; gamma/beta/bias stay f32 for BN math.
    return (jnp.stack(w_stack, axis=0).astype(jnp.bfloat16),
            jnp.stack(gb_stack, axis=0).astype(jnp.float32))


def aenet_forward(x, w_stack, gb, input_dim):
    """x: any shape whose trailing elements flatten to (-1, input_dim)."""
    x2d = x.reshape(-1, input_dim).astype(jnp.bfloat16)   # no zero-padding
    n = x2d.shape[0]

    vmem = pl.BlockSpec(memory_space=pltpu.MemorySpace.VMEM)
    recon, z = pl.pallas_call(
        _make_aenet_kernel(input_dim, n),
        out_shape=(
            jax.ShapeDtypeStruct((n, input_dim), jnp.float32),  # decoder(z)
            jax.ShapeDtypeStruct((n, Z_DIM), jnp.float32),      # latent z
        ),
        in_specs=[vmem, vmem, vmem],
        out_specs=(vmem, vmem),
        compiler_params=pltpu.CompilerParams(
            vmem_limit_bytes=32 * 1024 * 1024),   # explicit (v5e default is 16 MiB)
    )(x2d, w_stack, gb)
    return recon, z


if __name__ == "__main__":
    input_dim = 64
    block_size = 16
    # TODO(synk): cov_source / cov_target (block_size x block_size) buffers are
    # non-trainable state unused by forward(), so they are not materialized.

    key = jax.random.PRNGKey(0)
    key, k_x = jax.random.split(key)
    # x: (batch=2, seq=8, input_dim=64) -> view(-1, input_dim) = (16, 64)
    x = jax.random.normal(k_x, (2, 8, input_dim), jnp.float32)

    layers = _init_params(jax.random.PRNGKey(0), input_dim)
    w_stack, gb = _pack_params(layers)

    recon, z = aenet_forward(x, w_stack, gb, input_dim)
    jax.block_until_ready((recon, z))

    assert recon.shape == (16, input_dim), recon.shape
    assert z.shape == (16, Z_DIM), z.shape
    assert bool(jnp.all(jnp.isfinite(recon))) and bool(jnp.all(jnp.isfinite(z)))
    print("KERNEL_OK")
</pallas_src>

<mosaic_0001>
module attributes {stable_mosaic.version = 11 : i64} {
  func.func @kernel(%arg0: memref<16x64xbf16, #tpu.memory_space<vmem>>, %arg1: memref<10x128x128xbf16, #tpu.memory_space<vmem>>, %arg2: memref<10x2x128xf32, #tpu.memory_space<vmem>>, %arg3: memref<16x64xf32, #tpu.memory_space<vmem>>, %arg4: memref<16x8xf32, #tpu.memory_space<vmem>>) attributes {dimension_semantics = [], scalar_prefetch = 0 : i64, scratch_operands = 0 : i64, tpu.core_type = #tpu.core_type<tc>} {
    %c0 = arith.constant 0 : index
    %c0_0 = arith.constant 0 : index
    %0 = vector.load %arg0[%c0, %c0_0] : memref<16x64xbf16, #tpu.memory_space<vmem>>, vector<16x64xbf16>
    %c0_1 = arith.constant 0 : index
    %c0_2 = arith.constant 0 : index
    %c0_3 = arith.constant 0 : index
    %1 = vector.load %arg1[%c0_1, %c0_2, %c0_3] : memref<10x128x128xbf16, #tpu.memory_space<vmem>>, vector<1x64x128xbf16>
    %2 = vector.shape_cast %1 : vector<1x64x128xbf16> to vector<64x128xbf16>
    %cst = arith.constant dense<0.000000e+00> : vector<16x128xf32>
    %3 = tpu.matmul %0, %2, %cst {dimension_numbers = #tpu.dot_dimension_numbers<[1], [0], [0], [1], [0, 0, 1, 1], [], []>} : vector<16x64xbf16>, vector<64x128xbf16>, vector<16x128xf32> -> vector<16x128xf32>
    %c0_4 = arith.constant 0 : index
    %c0_5 = arith.constant 0 : index
    %c0_6 = arith.constant 0 : index
    %4 = vector.load %arg2[%c0_4, %c0_5, %c0_6] : memref<10x2x128xf32, #tpu.memory_space<vmem>>, vector<1x1x128xf32>
    %5 = vector.shape_cast %4 : vector<1x1x128xf32> to vector<1x128xf32>
    %c0_7 = arith.constant 0 : index
    %c1 = arith.constant 1 : index
    %c0_8 = arith.constant 0 : index
    %6 = vector.load %arg2[%c0_7, %c1, %c0_8] : memref<10x2x128xf32, #tpu.memory_space<vmem>>, vector<1x1x128xf32>
    %7 = vector.shape_cast %6 : vector<1x1x128xf32> to vector<1x128xf32>
    %cst_9 = arith.constant dense<0.000000e+00> : vector<128xf32>
    %8 = vector.multi_reduction <add>, %3, %cst_9 [0] : vector<16x128xf32> to vector<128xf32>
    %9 = vector.shape_cast %8 : vector<128xf32> to vector<1x128xf32>
    %cst_10 = arith.constant 6.250000e-02 : f32
    %10 = vector.broadcast %cst_10 : f32 to vector<1x128xf32>
    %11 = arith.mulf %9, %10 : vector<1x128xf32>
    %12 = arith.mulf %3, %3 : vector<16x128xf32>
    %cst_11 = arith.constant dense<0.000000e+00> : vector<128xf32>
    %13 = vector.multi_reduction <add>, %12, %cst_11 [0] : vector<16x128xf32> to vector<128xf32>
    %14 = vector.shape_cast %13 : vector<128xf32> to vector<1x128xf32>
    %cst_12 = arith.constant 6.250000e-02 : f32
    %15 = vector.broadcast %cst_12 : f32 to vector<1x128xf32>
    %16 = arith.mulf %14, %15 : vector<1x128xf32>
    %17 = arith.mulf %11, %11 : vector<1x128xf32>
    %18 = arith.subf %16, %17 : vector<1x128xf32>
    %cst_13 = arith.constant 1.000000e-03 : f32
    %19 = vector.broadcast %cst_13 : f32 to vector<1x128xf32>
    %20 = arith.addf %18, %19 : vector<1x128xf32>
    %21 = math.rsqrt %20 : vector<1x128xf32>
    %22 = arith.mulf %5, %21 : vector<1x128xf32>
    %23 = arith.mulf %11, %22 : vector<1x128xf32>
    %24 = arith.subf %7, %23 : vector<1x128xf32>
    %25 = vector.broadcast %22 : vector<1x128xf32> to vector<16x128xf32>
    %26 = arith.mulf %3, %25 : vector<16x128xf32>
    %27 = vector.broadcast %24 : vector<1x128xf32> to vector<16x128xf32>
    %28 = arith.addf %26, %27 : vector<16x128xf32>
    %cst_14 = arith.constant 0.000000e+00 : f32
    %29 = vector.broadcast %cst_14 : f32 to vector<16x128xf32>
    %30 = arith.maximumf %28, %29 : vector<16x128xf32>
    %31 = arith.truncf %30 : vector<16x128xf32> to vector<16x128xbf16>
    %c1_15 = arith.constant 1 : index
    %c0_16 = arith.constant 0 : index
    %c0_17 = arith.constant 0 : index
    %32 = vector.load %arg1[%c1_15, %c0_16, %c0_17] : memref<10x128x128xbf16, #tpu.memory_space<vmem>>, vector<1x128x128xbf16>
    %33 = vector.shape_cast %32 : vector<1x128x128xbf16> to vector<128x128xbf16>
    %cst_18 = arith.constant dense<0.000000e+00> : vector<16x128xf32>
    %34 = tpu.matmul %31, %33, %cst_18 {dimension_numbers = #tpu.dot_dimension_numbers<[1], [0], [0], [1], [0, 0, 1, 1], [], []>} : vector<16x128xbf16>, vector<128x128xbf16>, vector<16x128xf32> -> vector<16x128xf32>
    %c1_19 = arith.constant 1 : index
    %c0_20 = arith.constant 0 : index
    %c0_21 = arith.constant 0 : index
    %35 = vector.load %arg2[%c1_19, %c0_20, %c0_21] : memref<10x2x128xf32, #tpu.memory_space<vmem>>, vector<1x1x128xf32>
    %36 = vector.shape_cast %35 : vector<1x1x128xf32> to vector<1x128xf32>
    %c1_22 = arith.constant 1 : index
    %c1_23 = arith.constant 1 : index
    %c0_24 = arith.constant 0 : index
    %37 = vector.load %arg2[%c1_22, %c1_23, %c0_24] : memref<10x2x128xf32, #tpu.memory_space<vmem>>, vector<1x1x128xf32>
    %38 = vector.shape_cast %37 : vector<1x1x128xf32> to vector<1x128xf32>
    %cst_25 = arith.constant dense<0.000000e+00> : vector<128xf32>
    %39 = vector.multi_reduction <add>, %34, %cst_25 [0] : vector<16x128xf32> to vector<128xf32>
    %40 = vector.shape_cast %39 : vector<128xf32> to vector<1x128xf32>
    %cst_26 = arith.constant 6.250000e-02 : f32
    %41 = vector.broadcast %cst_26 : f32 to vector<1x128xf32>
    %42 = arith.mulf %40, %41 : vector<1x128xf32>
    %43 = arith.mulf %34, %34 : vector<16x128xf32>
    %cst_27 = arith.constant dense<0.000000e+00> : vector<128xf32>
    %44 = vector.multi_reduction <add>, %43, %cst_27 [0] : vector<16x128xf32> to vector<128xf32>
    %45 = vector.shape_cast %44 : vector<128xf32> to vector<1x128xf32>
    %cst_28 = arith.constant 6.250000e-02 : f32
    %46 = vector.broadcast %cst_28 : f32 to vector<1x128xf32>
    %47 = arith.mulf %45, %46 : vector<1x128xf32>
    %48 = arith.mulf %42, %42 : vector<1x128xf32>
    %49 = arith.subf %47, %48 : vector<1x128xf32>
    %cst_29 = arith.constant 1.000000e-03 : f32
    %50 = vector.broadcast %cst_29 : f32 to vector<1x128xf32>
    %51 = arith.addf %49, %50 : vector<1x128xf32>
    %52 = math.rsqrt %51 : vector<1x128xf32>
    %53 = arith.mulf %36, %52 : vector<1x128xf32>
    %54 = arith.mulf %42, %53 : vector<1x128xf32>
    %55 = arith.subf %38, %54 : vector<1x128xf32>
    %56 = vector.broadcast %53 : vector<1x128xf32> to vector<16x128xf32>
    %57 = arith.mulf %34, %56 : vector<16x128xf32>
    %58 = vector.broadcast %55 : vector<1x128xf32> to vector<16x128xf32>
    %59 = arith.addf %57, %58 : vector<16x128xf32>
    %cst_30 = arith.constant 0.000000e+00 : f32
    %60 = vector.broadcast %cst_30 : f32 to vector<16x128xf32>
    %61 = arith.maximumf %59, %60 : vector<16x128xf32>
    %62 = arith.truncf %61 : vector<16x128xf32> to vector<16x128xbf16>
    %c2 = arith.constant 2 : index
    %c0_31 = arith.constant 0 : index
    %c0_32 = arith.constant 0 : index
    %63 = vector.load %arg1[%c2, %c0_31, %c0_32] : memref<10x128x128xbf16, #tpu.memory_space<vmem>>, vector<1x128x128xbf16>
    %64 = vector.shape_cast %63 : vector<1x128x128xbf16> to vector<128x128xbf16>
    %cst_33 = arith.constant dense<0.000000e+00> : vector<16x128xf32>
    %65 = tpu.matmul %62, %64, %cst_33 {dimension_numbers = #tpu.dot_dimension_numbers<[1], [0], [0], [1], [0, 0, 1, 1], [], []>} : vector<16x128xbf16>, vector<128x128xbf16>, vector<16x128xf32> -> vector<16x128xf32>
    %c2_34 = arith.constant 2 : index
    %c0_35 = arith.constant 0 : index
    %c0_36 = arith.constant 0 : index
    %66 = vector.load %arg2[%c2_34, %c0_35, %c0_36] : memref<10x2x128xf32, #tpu.memory_space<vmem>>, vector<1x1x128xf32>
    %67 = vector.shape_cast %66 : vector<1x1x128xf32> to vector<1x128xf32>
    %c2_37 = arith.constant 2 : index
    %c1_38 = arith.constant 1 : index
    %c0_39 = arith.constant 0 : index
    %68 = vector.load %arg2[%c2_37, %c1_38, %c0_39] : memref<10x2x128xf32, #tpu.memory_space<vmem>>, vector<1x1x128xf32>
    %69 = vector.shape_cast %68 : vector<1x1x128xf32> to vector<1x128xf32>
    %cst_40 = arith.constant dense<0.000000e+00> : vector<128xf32>
    %70 = vector.multi_reduction <add>, %65, %cst_40 [0] : vector<16x128xf32> to vector<128xf32>
    %71 = vector.shape_cast %70 : vector<128xf32> to vector<1x128xf32>
    %cst_41 = arith.constant 6.250000e-02 : f32
    %72 = vector.broadcast %cst_41 : f32 to vector<1x128xf32>
    %73 = arith.mulf %71, %72 : vector<1x128xf32>
    %74 = arith.mulf %65, %65 : vector<16x128xf32>
    %cst_42 = arith.constant dense<0.000000e+00> : vector<128xf32>
    %75 = vector.multi_reduction <add>, %74, %cst_42 [0] : vector<16x128xf32> to vector<128xf32>
    %76 = vector.shape_cast %75 : vector<128xf32> to vector<1x128xf32>
    %cst_43 = arith.constant 6.250000e-02 : f32
    %77 = vector.broadcast %cst_43 : f32 to vector<1x128xf32>
    %78 = arith.mulf %76, %77 : vector<1x128xf32>
    %79 = arith.mulf %73, %73 : vector<1x128xf32>
    %80 = arith.subf %78, %79 : vector<1x128xf32>
    %cst_44 = arith.constant 1.000000e-03 : f32
    %81 = vector.broadcast %cst_44 : f32 to vector<1x128xf32>
    %82 = arith.addf %80, %81 : vector<1x128xf32>
    %83 = math.rsqrt %82 : vector<1x128xf32>
    %84 = arith.mulf %67, %83 : vector<1x128xf32>
    %85 = arith.mulf %73, %84 : vector<1x128xf32>
    %86 = arith.subf %69, %85 : vector<1x128xf32>
    %87 = vector.broadcast %84 : vector<1x128xf32> to vector<16x128xf32>
    %88 = arith.mulf %65, %87 : vector<16x128xf32>
    %89 = vector.broadcast %86 : vector<1x128xf32> to vector<16x128xf32>
    %90 = arith.addf %88, %89 : vector<16x128xf32>
    %cst_45 = arith.constant 0.000000e+00 : f32
    %91 = vector.broadcast %cst_45 : f32 to vector<16x128xf32>
    %92 = arith.maximumf %90, %91 : vector<16x128xf32>
    %93 = arith.truncf %92 : vector<16x128xf32> to vector<16x128xbf16>
    %c3 = arith.constant 3 : index
    %c0_46 = arith.constant 0 : index
    %c0_47 = arith.constant 0 : index
    %94 = vector.load %arg1[%c3, %c0_46, %c0_47] : memref<10x128x128xbf16, #tpu.memory_space<vmem>>, vector<1x128x128xbf16>
    %95 = vector.shape_cast %94 : vector<1x128x128xbf16> to vector<128x128xbf16>
    %cst_48 = arith.constant dense<0.000000e+00> : vector<16x128xf32>
    %96 = tpu.matmul %93, %95, %cst_48 {dimension_numbers = #tpu.dot_dimension_numbers<[1], [0], [0], [1], [0, 0, 1, 1], [], []>} : vector<16x128xbf16>, vector<128x128xbf16>, vector<16x128xf32> -> vector<16x128xf32>
    %c3_49 = arith.constant 3 : index
    %c0_50 = arith.constant 0 : index
    %c0_51 = arith.constant 0 : index
    %97 = vector.load %arg2[%c3_49, %c0_50, %c0_51] : memref<10x2x128xf32, #tpu.memory_space<vmem>>, vector<1x1x128xf32>
    %98 = vector.shape_cast %97 : vector<1x1x128xf32> to vector<1x128xf32>
    %c3_52 = arith.constant 3 : index
    %c1_53 = arith.constant 1 : index
    %c0_54 = arith.constant 0 : index
    %99 = vector.load %arg2[%c3_52, %c1_53, %c0_54] : memref<10x2x128xf32, #tpu.memory_space<vmem>>, vector<1x1x128xf32>
    %100 = vector.shape_cast %99 : vector<1x1x128xf32> to vector<1x128xf32>
    %cst_55 = arith.constant dense<0.000000e+00> : vector<128xf32>
    %101 = vector.multi_reduction <add>, %96, %cst_55 [0] : vector<16x128xf32> to vector<128xf32>
    %102 = vector.shape_cast %101 : vector<128xf32> to vector<1x128xf32>
    %cst_56 = arith.constant 6.250000e-02 : f32
    %103 = vector.broadcast %cst_56 : f32 to vector<1x128xf32>
    %104 = arith.mulf %102, %103 : vector<1x128xf32>
    %105 = arith.mulf %96, %96 : vector<16x128xf32>
    %cst_57 = arith.constant dense<0.000000e+00> : vector<128xf32>
    %106 = vector.multi_reduction <add>, %105, %cst_57 [0] : vector<16x128xf32> to vector<128xf32>
    %107 = vector.shape_cast %106 : vector<128xf32> to vector<1x128xf32>
    %cst_58 = arith.constant 6.250000e-02 : f32
    %108 = vector.broadcast %cst_58 : f32 to vector<1x128xf32>
    %109 = arith.mulf %107, %108 : vector<1x128xf32>
    %110 = arith.mulf %104, %104 : vector<1x128xf32>
    %111 = arith.subf %109, %110 : vector<1x128xf32>
    %cst_59 = arith.constant 1.000000e-03 : f32
    %112 = vector.broadcast %cst_59 : f32 to vector<1x128xf32>
    %113 = arith.addf %111, %112 : vector<1x128xf32>
    %114 = math.rsqrt %113 : vector<1x128xf32>
    %115 = arith.mulf %98, %114 : vector<1x128xf32>
    %116 = arith.mulf %104, %115 : vector<1x128xf32>
    %117 = arith.subf %100, %116 : vector<1x128xf32>
    %118 = vector.broadcast %115 : vector<1x128xf32> to vector<16x128xf32>
    %119 = arith.mulf %96, %118 : vector<16x128xf32>
    %120 = vector.broadcast %117 : vector<1x128xf32> to vector<16x128xf32>
    %121 = arith.addf %119, %120 : vector<16x128xf32>
    %cst_60 = arith.constant 0.000000e+00 : f32
    %122 = vector.broadcast %cst_60 : f32 to vector<16x128xf32>
    %123 = arith.maximumf %121, %122 : vector<16x128xf32>
    %124 = arith.truncf %123 : vector<16x128xf32> to vector<16x128xbf16>
    %c4 = arith.constant 4 : index
    %c0_61 = arith.constant 0 : index
    %c0_62 = arith.constant 0 : index
    %125 = vector.load %arg1[%c4, %c0_61, %c0_62] : memref<10x128x128xbf16, #tpu.memory_space<vmem>>, vector<1x128x128xbf16>
    %126 = vector.shape_cast %125 : vector<1x128x128xbf16> to vector<128x128xbf16>
    %cst_63 = arith.constant dense<0.000000e+00> : vector<16x128xf32>
    %127 = tpu.matmul %124, %126, %cst_63 {dimension_numbers = #tpu.dot_dimension_numbers<[1], [0], [0], [1], [0, 0, 1, 1], [], []>} : vector<16x128xbf16>, vector<128x128xbf16>, vector<16x128xf32> -> vector<16x128xf32>
    %c4_64 = arith.constant 4 : index
    %c0_65 = arith.constant 0 : index
    %c0_66 = arith.constant 0 : index
    %128 = vector.load %arg2[%c4_64, %c0_65, %c0_66] : memref<10x2x128xf32, #tpu.memory_space<vmem>>, vector<1x1x128xf32>
    %129 = vector.shape_cast %128 : vector<1x1x128xf32> to vector<1x128xf32>
    %c4_67 = arith.constant 4 : index
    %c1_68 = arith.constant 1 : index
    %c0_69 = arith.constant 0 : index
    %130 = vector.load %arg2[%c4_67, %c1_68, %c0_69] : memref<10x2x128xf32, #tpu.memory_space<vmem>>, vector<1x1x128xf32>
    %131 = vector.shape_cast %130 : vector<1x1x128xf32> to vector<1x128xf32>
    %cst_70 = arith.constant dense<0.000000e+00> : vector<128xf32>
    %132 = vector.multi_reduction <add>, %127, %cst_70 [0] : vector<16x128xf32> to vector<128xf32>
    %133 = vector.shape_cast %132 : vector<128xf32> to vector<1x128xf32>
    %cst_71 = arith.constant 6.250000e-02 : f32
    %134 = vector.broadcast %cst_71 : f32 to vector<1x128xf32>
    %135 = arith.mulf %133, %134 : vector<1x128xf32>
    %136 = arith.mulf %127, %127 : vector<16x128xf32>
    %cst_72 = arith.constant dense<0.000000e+00> : vector<128xf32>
    %137 = vector.multi_reduction <add>, %136, %cst_72 [0] : vector<16x128xf32> to vector<128xf32>
    %138 = vector.shape_cast %137 : vector<128xf32> to vector<1x128xf32>
    %cst_73 = arith.constant 6.250000e-02 : f32
    %139 = vector.broadcast %cst_73 : f32 to vector<1x128xf32>
    %140 = arith.mulf %138, %139 : vector<1x128xf32>
    %141 = arith.mulf %135, %135 : vector<1x128xf32>
    %142 = arith.subf %140, %141 : vector<1x128xf32>
    %cst_74 = arith.constant 1.000000e-03 : f32
    %143 = vector.broadcast %cst_74 : f32 to vector<1x128xf32>
    %144 = arith.addf %142, %143 : vector<1x128xf32>
    %145 = math.rsqrt %144 : vector<1x128xf32>
    %146 = arith.mulf %129, %145 : vector<1x128xf32>
    %147 = arith.mulf %135, %146 : vector<1x128xf32>
    %148 = arith.subf %131, %147 : vector<1x128xf32>
    %149 = vector.broadcast %146 : vector<1x128xf32> to vector<16x128xf32>
    %150 = arith.mulf %127, %149 : vector<16x128xf32>
    %151 = vector.broadcast %148 : vector<1x128xf32> to vector<16x128xf32>
    %152 = arith.addf %150, %151 : vector<16x128xf32>
    %cst_75 = arith.constant 0.000000e+00 : f32
    %153 = vector.broadcast %cst_75 : f32 to vector<16x128xf32>
    %154 = arith.maximumf %152, %153 : vector<16x128xf32>
    %155 = vector.extract_strided_slice %154 {offsets = [0, 0], sizes = [16, 8], strides = [1, 1]} : vector<16x128xf32> to vector<16x8xf32>
    %c0_76 = arith.constant 0 : index
    %c0_77 = arith.constant 0 : index
    %156 = vector.load %arg4[%c0_76, %c0_77] : memref<16x8xf32, #tpu.memory_space<vmem>>, vector<16x8xf32>
    tpu.vector_store %arg4[%c0_76, %c0_77], %155 {strides = array<i32>} : memref<16x8xf32, #tpu.memory_space<vmem>>, vector<16x8xf32>,
    %157 = arith.truncf %154 : vector<16x128xf32> to vector<16x128xbf16>
    %c5 = arith.constant 5 : index
    %c0_78 = arith.constant 0 : index
    %c0_79 = arith.constant 0 : index
    %158 = vector.load %arg1[%c5, %c0_78, %c0_79] : memref<10x128x128xbf16, #tpu.memory_space<vmem>>, vector<1x128x128xbf16>
    %159 = vector.shape_cast %158 : vector<1x128x128xbf16> to vector<128x128xbf16>
    %cst_80 = arith.constant dense<0.000000e+00> : vector<16x128xf32>
    %160 = tpu.matmul %157, %159, %cst_80 {dimension_numbers = #tpu.dot_dimension_numbers<[1], [0], [0], [1], [0, 0, 1, 1], [], []>} : vector<16x128xbf16>, vector<128x128xbf16>, vector<16x128xf32> -> vector<16x128xf32>
    %c5_81 = arith.constant 5 : index
    %c0_82 = arith.constant 0 : index
    %c0_83 = arith.constant 0 : index
    %161 = vector.load %arg2[%c5_81, %c0_82, %c0_83] : memref<10x2x128xf32, #tpu.memory_space<vmem>>, vector<1x1x128xf32>
    %162 = vector.shape_cast %161 : vector<1x1x128xf32> to vector<1x128xf32>
    %c5_84 = arith.constant 5 : index
    %c1_85 = arith.constant 1 : index
    %c0_86 = arith.constant 0 : index
    %163 = vector.load %arg2[%c5_84, %c1_85, %c0_86] : memref<10x2x128xf32, #tpu.memory_space<vmem>>, vector<1x1x128xf32>
    %164 = vector.shape_cast %163 : vector<1x1x128xf32> to vector<1x128xf32>
    %cst_87 = arith.constant dense<0.000000e+00> : vector<128xf32>
    %165 = vector.multi_reduction <add>, %160, %cst_87 [0] : vector<16x128xf32> to vector<128xf32>
    %166 = vector.shape_cast %165 : vector<128xf32> to vector<1x128xf32>
    %cst_88 = arith.constant 6.250000e-02 : f32
    %167 = vector.broadcast %cst_88 : f32 to vector<1x128xf32>
    %168 = arith.mulf %166, %167 : vector<1x128xf32>
    %169 = arith.mulf %160, %160 : vector<16x128xf32>
    %cst_89 = arith.constant dense<0.000000e+00> : vector<128xf32>
    %170 = vector.multi_reduction <add>, %169, %cst_89 [0] : vector<16x128xf32> to vector<128xf32>
    %171 = vector.shape_cast %170 : vector<128xf32> to vector<1x128xf32>
    %cst_90 = arith.constant 6.250000e-02 : f32
    %172 = vector.broadcast %cst_90 : f32 to vector<1x128xf32>
    %173 = arith.mulf %171, %172 : vector<1x128xf32>
    %174 = arith.mulf %168, %168 : vector<1x128xf32>
    %175 = arith.subf %173, %174 : vector<1x128xf32>
    %cst_91 = arith.constant 1.000000e-03 : f32
    %176 = vector.broadcast %cst_91 : f32 to vector<1x128xf32>
    %177 = arith.addf %175, %176 : vector<1x128xf32>
    %178 = math.rsqrt %177 : vector<1x128xf32>
    %179 = arith.mulf %162, %178 : vector<1x128xf32>
    %180 = arith.mulf %168, %179 : vector<1x128xf32>
    %181 = arith.subf %164, %180 : vector<1x128xf32>
    %182 = vector.broadcast %179 : vector<1x128xf32> to vector<16x128xf32>
    %183 = arith.mulf %160, %182 : vector<16x128xf32>
    %184 = vector.broadcast %181 : vector<1x128xf32> to vector<16x128xf32>
    %185 = arith.addf %183, %184 : vector<16x128xf32>
    %cst_92 = arith.constant 0.000000e+00 : f32
    %186 = vector.broadcast %cst_92 : f32 to vector<16x128xf32>
    %187 = arith.maximumf %185, %186 : vector<16x128xf32>
    %188 = arith.truncf %187 : vector<16x128xf32> to vector<16x128xbf16>
    %c6 = arith.constant 6 : index
    %c0_93 = arith.constant 0 : index
    %c0_94 = arith.constant 0 : index
    %189 = vector.load %arg1[%c6, %c0_93, %c0_94] : memref<10x128x128xbf16, #tpu.memory_space<vmem>>, vector<1x128x128xbf16>
    %190 = vector.shape_cast %189 : vector<1x128x128xbf16> to vector<128x128xbf16>
    %cst_95 = arith.constant dense<0.000000e+00> : vector<16x128xf32>
    %191 = tpu.matmul %188, %190, %cst_95 {dimension_numbers = #tpu.dot_dimension_numbers<[1], [0], [0], [1], [0, 0, 1, 1], [], []>} : vector<16x128xbf16>, vector<128x128xbf16>, vector<16x128xf32> -> vector<16x128xf32>
    %c6_96 = arith.constant 6 : index
    %c0_97 = arith.constant 0 : index
    %c0_98 = arith.constant 0 : index
    %192 = vector.load %arg2[%c6_96, %c0_97, %c0_98] : memref<10x2x128xf32, #tpu.memory_space<vmem>>, vector<1x1x128xf32>
    %193 = vector.shape_cast %192 : vector<1x1x128xf32> to vector<1x128xf32>
    %c6_99 = arith.constant 6 : index
    %c1_100 = arith.constant 1 : index
    %c0_101 = arith.constant 0 : index
    %194 = vector.load %arg2[%c6_99, %c1_100, %c0_101] : memref<10x2x128xf32, #tpu.memory_space<vmem>>, vector<1x1x128xf32>
    %195 = vector.shape_cast %194 : vector<1x1x128xf32> to vector<1x128xf32>
    %cst_102 = arith.constant dense<0.000000e+00> : vector<128xf32>
    %196 = vector.multi_reduction <add>, %191, %cst_102 [0] : vector<16x128xf32> to vector<128xf32>
    %197 = vector.shape_cast %196 : vector<128xf32> to vector<1x128xf32>
    %cst_103 = arith.constant 6.250000e-02 : f32
    %198 = vector.broadcast %cst_103 : f32 to vector<1x128xf32>
    %199 = arith.mulf %197, %198 : vector<1x128xf32>
    %200 = arith.mulf %191, %191 : vector<16x128xf32>
    %cst_104 = arith.constant dense<0.000000e+00> : vector<128xf32>
    %201 = vector.multi_reduction <add>, %200, %cst_104 [0] : vector<16x128xf32> to vector<128xf32>
    %202 = vector.shape_cast %201 : vector<128xf32> to vector<1x128xf32>
    %cst_105 = arith.constant 6.250000e-02 : f32
    %203 = vector.broadcast %cst_105 : f32 to vector<1x128xf32>
    %204 = arith.mulf %202, %203 : vector<1x128xf32>
    %205 = arith.mulf %199, %199 : vector<1x128xf32>
    %206 = arith.subf %204, %205 : vector<1x128xf32>
    %cst_106 = arith.constant 1.000000e-03 : f32
    %207 = vector.broadcast %cst_106 : f32 to vector<1x128xf32>
    %208 = arith.addf %206, %207 : vector<1x128xf32>
    %209 = math.rsqrt %208 : vector<1x128xf32>
    %210 = arith.mulf %193, %209 : vector<1x128xf32>
    %211 = arith.mulf %199, %210 : vector<1x128xf32>
    %212 = arith.subf %195, %211 : vector<1x128xf32>
    %213 = vector.broadcast %210 : vector<1x128xf32> to vector<16x128xf32>
    %214 = arith.mulf %191, %213 : vector<16x128xf32>
    %215 = vector.broadcast %212 : vector<1x128xf32> to vector<16x128xf32>
    %216 = arith.addf %214, %215 : vector<16x128xf32>
    %cst_107 = arith.constant 0.000000e+00 : f32
    %217 = vector.broadcast %cst_107 : f32 to vector<16x128xf32>
    %218 = arith.maximumf %216, %217 : vector<16x128xf32>
    %219 = arith.truncf %218 : vector<16x128xf32> to vector<16x128xbf16>
    %c7 = arith.constant 7 : index
    %c0_108 = arith.constant 0 : index
    %c0_109 = arith.constant 0 : index
    %220 = vector.load %arg1[%c7, %c0_108, %c0_109] : memref<10x128x128xbf16, #tpu.memory_space<vmem>>, vector<1x128x128xbf16>
    %221 = vector.shape_cast %220 : vector<1x128x128xbf16> to vector<128x128xbf16>
    %cst_110 = arith.constant dense<0.000000e+00> : vector<16x128xf32>
    %222 = tpu.matmul %219, %221, %cst_110 {dimension_numbers = #tpu.dot_dimension_numbers<[1], [0], [0], [1], [0, 0, 1, 1], [], []>} : vector<16x128xbf16>, vector<128x128xbf16>, vector<16x128xf32> -> vector<16x128xf32>
    %c7_111 = arith.constant 7 : index
    %c0_112 = arith.constant 0 : index
    %c0_113 = arith.constant 0 : index
    %223 = vector.load %arg2[%c7_111, %c0_112, %c0_113] : memref<10x2x128xf32, #tpu.memory_space<vmem>>, vector<1x1x128xf32>
    %224 = vector.shape_cast %223 : vector<1x1x128xf32> to vector<1x128xf32>
    %c7_114 = arith.constant 7 : index
    %c1_115 = arith.constant 1 : index
    %c0_116 = arith.constant 0 : index
    %225 = vector.load %arg2[%c7_114, %c1_115, %c0_116] : memref<10x2x128xf32, #tpu.memory_space<vmem>>, vector<1x1x128xf32>
    %226 = vector.shape_cast %225 : vector<1x1x128xf32> to vector<1x128xf32>
    %cst_117 = arith.constant dense<0.000000e+00> : vector<128xf32>
    %227 = vector.multi_reduction <add>, %222, %cst_117 [0] : vector<16x128xf32> to vector<128xf32>
    %228 = vector.shape_cast %227 : vector<128xf32> to vector<1x128xf32>
    %cst_118 = arith.constant 6.250000e-02 : f32
    %229 = vector.broadcast %cst_118 : f32 to vector<1x128xf32>
    %230 = arith.mulf %228, %229 : vector<1x128xf32>
    %231 = arith.mulf %222, %222 : vector<16x128xf32>
    %cst_119 = arith.constant dense<0.000000e+00> : vector<128xf32>
    %232 = vector.multi_reduction <add>, %231, %cst_119 [0] : vector<16x128xf32> to vector<128xf32>
    %233 = vector.shape_cast %232 : vector<128xf32> to vector<1x128xf32>
    %cst_120 = arith.constant 6.250000e-02 : f32
    %234 = vector.broadcast %cst_120 : f32 to vector<1x128xf32>
    %235 = arith.mulf %233, %234 : vector<1x128xf32>
    %236 = arith.mulf %230, %230 : vector<1x128xf32>
    %237 = arith.subf %235, %236 : vector<1x128xf32>
    %cst_121 = arith.constant 1.000000e-03 : f32
    %238 = vector.broadcast %cst_121 : f32 to vector<1x128xf32>
    %239 = arith.addf %237, %238 : vector<1x128xf32>
    %240 = math.rsqrt %239 : vector<1x128xf32>
    %241 = arith.mulf %224, %240 : vector<1x128xf32>
    %242 = arith.mulf %230, %241 : vector<1x128xf32>
    %243 = arith.subf %226, %242 : vector<1x128xf32>
    %244 = vector.broadcast %241 : vector<1x128xf32> to vector<16x128xf32>
    %245 = arith.mulf %222, %244 : vector<16x128xf32>
    %246 = vector.broadcast %243 : vector<1x128xf32> to vector<16x128xf32>
    %247 = arith.addf %245, %246 : vector<16x128xf32>
    %cst_122 = arith.constant 0.000000e+00 : f32
    %248 = vector.broadcast %cst_122 : f32 to vector<16x128xf32>
    %249 = arith.maximumf %247, %248 : vector<16x128xf32>
    %250 = arith.truncf %249 : vector<16x128xf32> to vector<16x128xbf16>
    %c8 = arith.constant 8 : index
    %c0_123 = arith.constant 0 : index
    %c0_124 = arith.constant 0 : index
    %251 = vector.load %arg1[%c8, %c0_123, %c0_124] : memref<10x128x128xbf16, #tpu.memory_space<vmem>>, vector<1x128x128xbf16>
    %252 = vector.shape_cast %251 : vector<1x128x128xbf16> to vector<128x128xbf16>
    %cst_125 = arith.constant dense<0.000000e+00> : vector<16x128xf32>
    %253 = tpu.matmul %250, %252, %cst_125 {dimension_numbers = #tpu.dot_dimension_numbers<[1], [0], [0], [1], [0, 0, 1, 1], [], []>} : vector<16x128xbf16>, vector<128x128xbf16>, vector<16x128xf32> -> vector<16x128xf32>
    %c8_126 = arith.constant 8 : index
    %c0_127 = arith.constant 0 : index
    %c0_128 = arith.constant 0 : index
    %254 = vector.load %arg2[%c8_126, %c0_127, %c0_128] : memref<10x2x128xf32, #tpu.memory_space<vmem>>, vector<1x1x128xf32>
    %255 = vector.shape_cast %254 : vector<1x1x128xf32> to vector<1x128xf32>
    %c8_129 = arith.constant 8 : index
    %c1_130 = arith.constant 1 : index
    %c0_131 = arith.constant 0 : index
    %256 = vector.load %arg2[%c8_129, %c1_130, %c0_131] : memref<10x2x128xf32, #tpu.memory_space<vmem>>, vector<1x1x128xf32>
    %257 = vector.shape_cast %256 : vector<1x1x128xf32> to vector<1x128xf32>
    %cst_132 = arith.constant dense<0.000000e+00> : vector<128xf32>
    %258 = vector.multi_reduction <add>, %253, %cst_132 [0] : vector<16x128xf32> to vector<128xf32>
    %259 = vector.shape_cast %258 : vector<128xf32> to vector<1x128xf32>
    %cst_133 = arith.constant 6.250000e-02 : f32
    %260 = vector.broadcast %cst_133 : f32 to vector<1x128xf32>
    %261 = arith.mulf %259, %260 : vector<1x128xf32>
    %262 = arith.mulf %253, %253 : vector<16x128xf32>
    %cst_134 = arith.constant dense<0.000000e+00> : vector<128xf32>
    %263 = vector.multi_reduction <add>, %262, %cst_134 [0] : vector<16x128xf32> to vector<128xf32>
    %264 = vector.shape_cast %263 : vector<128xf32> to vector<1x128xf32>
    %cst_135 = arith.constant 6.250000e-02 : f32
    %265 = vector.broadcast %cst_135 : f32 to vector<1x128xf32>
    %266 = arith.mulf %264, %265 : vector<1x128xf32>
    %267 = arith.mulf %261, %261 : vector<1x128xf32>
    %268 = arith.subf %266, %267 : vector<1x128xf32>
    %cst_136 = arith.constant 1.000000e-03 : f32
    %269 = vector.broadcast %cst_136 : f32 to vector<1x128xf32>
    %270 = arith.addf %268, %269 : vector<1x128xf32>
    %271 = math.rsqrt %270 : vector<1x128xf32>
    %272 = arith.mulf %255, %271 : vector<1x128xf32>
    %273 = arith.mulf %261, %272 : vector<1x128xf32>
    %274 = arith.subf %257, %273 : vector<1x128xf32>
    %275 = vector.broadcast %272 : vector<1x128xf32> to vector<16x128xf32>
    %276 = arith.mulf %253, %275 : vector<16x128xf32>
    %277 = vector.broadcast %274 : vector<1x128xf32> to vector<16x128xf32>
    %278 = arith.addf %276, %277 : vector<16x128xf32>
    %cst_137 = arith.constant 0.000000e+00 : f32
    %279 = vector.broadcast %cst_137 : f32 to vector<16x128xf32>
    %280 = arith.maximumf %278, %279 : vector<16x128xf32>
    %281 = arith.truncf %280 : vector<16x128xf32> to vector<16x128xbf16>
    %c9 = arith.constant 9 : index
    %c0_138 = arith.constant 0 : index
    %c0_139 = arith.constant 0 : index
    %282 = vector.load %arg1[%c9, %c0_138, %c0_139] : memref<10x128x128xbf16, #tpu.memory_space<vmem>>, vector<1x128x128xbf16>
    %283 = vector.shape_cast %282 : vector<1x128x128xbf16> to vector<128x128xbf16>
    %cst_140 = arith.constant dense<0.000000e+00> : vector<16x128xf32>
    %284 = tpu.matmul %281, %283, %cst_140 {dimension_numbers = #tpu.dot_dimension_numbers<[1], [0], [0], [1], [0, 0, 1, 1], [], []>} : vector<16x128xbf16>, vector<128x128xbf16>, vector<16x128xf32> -> vector<16x128xf32>
    %c9_141 = arith.constant 9 : index
    %c0_142 = arith.constant 0 : index
    %c0_143 = arith.constant 0 : index
    %285 = vector.load %arg2[%c9_141, %c0_142, %c0_143] : memref<10x2x128xf32, #tpu.memory_space<vmem>>, vector<1x1x128xf32>
    %286 = vector.shape_cast %285 : vector<1x1x128xf32> to vector<1x128xf32>
    %287 = vector.broadcast %286 : vector<1x128xf32> to vector<16x128xf32>
    %288 = arith.addf %284, %287 : vector<16x128xf32>
    %289 = vector.extract_strided_slice %288 {offsets = [0, 0], sizes = [16, 64], strides = [1, 1]} : vector<16x128xf32> to vector<16x64xf32>
    %c0_144 = arith.constant 0 : index
    %c0_145 = arith.constant 0 : index
    %290 = vector.load %arg3[%c0_144, %c0_145] : memref<16x64xf32, #tpu.memory_space<vmem>>, vector<16x64xf32>
    tpu.vector_store %arg3[%c0_144, %c0_145], %289 {strides = array<i32>} : memref<16x64xf32, #tpu.memory_space<vmem>>, vector<16x64xf32>,
    return
  }
}

</mosaic_0001>

<bundles_post_ra>
// kernel: tpu_custom_call.1
= control target key start
LH: loop header
LB: loop body
LE: loop exit
PB: predicated region body
PF: predicated region fallthrough
CT: control target
= control target key end

     0   :  { %10 = vsyncpa [#allocation3], 0  ;;  %s2291_s0 = inlined_call_operand.hbm [shape: bf16[16,64], index: 0, kind: input, shape index: {}]   ;;  %s2292_s1 = inlined_call_operand.hbm [shape: bf16[10,128,128], index: 1, kind: input, shape index: {}]   ;;  %s2293_s2 = inlined_call_operand.hbm [shape: f32[10,2,128], index: 2, kind: input, shape index: {}]   ;;  %s2294_s3 = inlined_call_operand.hbm [shape: f32[16,64], index: 3, kind: output, shape index: {0}]   ;;  %s2295_s4 = inlined_call_operand.vmem [shape: f32[16,8], index: 4, kind: output, shape index: {1}]  }
   0x1   :  { %11 = vsyncpa [#allocation6], 0 }
   0x2   :  { %12 = vsyncpa [#allocation4], 0  ;;  %s2074_s15 = smov [#allocation5]   ;;  %s2075_s17 = smov [#allocation2]  }
   0x3   :  { %s30_s16 = sshll.u32 %s2074_s15, 4  ;;  %s18_s18 = sshll.u32 %s2075_s17, 4  ;;  %s31_s16 = int_to_ptr.vmem [resolvable:$true] %s30_s16  ;;  %s2111_s18 = int_to_ptr.vmem [resolvable:$true] %s18_s18 }
   0x4   :  { %s1980_s21 = scalar_lea.hbm %s2292_s1, 10240 }
   0x5   :  { %p1981_p0 = scmp.ne.s32.totalorder %s2292_s1, %s1980_s21  ;;  %p1984_p1 = scmp.lt.u32.totalorder %s1980_s21, %s2292_s1 }
   0x7   :  { %p1986_p2 = pnand %p1984_p1, %p1981_p0 }
   0x9   :  { %1989 = shalt.err (!%p1986_p2)
}
   0xa   :  { %s1990_s26 = scalar_lea.vmem %s31_s16, 10240  ;;  %p1995_p4 = scmp.lt.s32.totalorder %s31_s16, %s31_s16 }
   0xb   :  { %p1991_p3 = scmp.ne.s32.totalorder %s31_s16, %s1990_s26  ;;  %p1996_p5 = scmp.lt.s32.totalorder %s1990_s26, %s1990_s26 }
   0xd   :  { %p1997_p6 = por %p1996_p5, %p1995_p4 }
   0xf   :  { %p1998_p7 = pnand %p1997_p6, %p1991_p3 }
  0x11   :  { %2001 = shalt.err (!%p1998_p7)
}
  0x12   :  { %s2076_s27 = smov 64   ;;  %s2077_s28 = smov 4  }
  0x13   :  { %36 = dma.hbm_to_vmem [thread:$0]  %s2292_s1, 10240, %s31_s16, [#allocation6], %s2076_s27, %s2076_s27, %s2077_s28  }
  0x14   :  { %s2002_s7 = scalar_lea.hbm %s2291_s0, 128 }
  0x15   :  { %p2003_p8 = scmp.ne.s32.totalorder %s2291_s0, %s2002_s7  ;;  %p2006_p9 = scmp.lt.u32.totalorder %s2002_s7, %s2291_s0 }
  0x17   :  { %p2008_p10 = pnand %p2006_p9, %p2003_p8 }
  0x19   :  { %2011 = shalt.err (!%p2008_p10)
}
  0x1a   :  { %s2012_s12 = scalar_lea.vmem %s2111_s18, 128  ;;  %p2017_p12 = scmp.lt.s32.totalorder %s2111_s18, %s2111_s18 }
  0x1b   :  { %p2013_p11 = scmp.ne.s32.totalorder %s2111_s18, %s2012_s12  ;;  %p2018_p13 = scmp.lt.s32.totalorder %s2012_s12, %s2012_s12 }
  0x1d   :  { %p2019_p0 = por %p2018_p13, %p2017_p12 }
  0x1f   :  { %p2020_p1 = pnand %p2019_p0, %p2013_p11 }
  0x21   :  { %2023 = shalt.err (!%p2020_p1)
}
  0x22   :  { %24 = dma.hbm_to_vmem [thread:$0]  %s2291_s0, 128, %s2111_s18, [#allocation3], %s2076_s27, %s2076_s27, %s2077_s28  }
  0x23   :  { %s2078_s14 = smov [#allocation7]   ;;  %s2024_s19 = scalar_lea.hbm %s2293_s2, 320 }
  0x24   :  { %s42_s15 = sshll.u32 %s2078_s14, 4  ;;  %p2025_p2 = scmp.ne.s32.totalorder %s2293_s2, %s2024_s19  ;;  %s43_s15 = int_to_ptr.vmem [resolvable:$true] %s42_s15 }
  0x25   :  { %p2028_p3 = scmp.lt.u32.totalorder %s2024_s19, %s2293_s2 }
  0x27   :  { %p2030_p4 = pnand %p2028_p3, %p2025_p2 }
  0x29   :  { %2033 = shalt.err (!%p2030_p4)
}
  0x2a   :  { %s2034_s24 = scalar_lea.vmem %s43_s15, 320  ;;  %p2039_p6 = scmp.lt.s32.totalorder %s43_s15, %s43_s15 }
  0x2b   :  { %p2035_p5 = scmp.ne.s32.totalorder %s43_s15, %s2034_s24  ;;  %p2040_p7 = scmp.lt.s32.totalorder %s2034_s24, %s2034_s24 }
  0x2d   :  { %p2041_p8 = por %p2040_p7, %p2039_p6 }
  0x2f   :  { %p2042_p9 = pnand %p2041_p8, %p2035_p5 }
  0x31   :  { %2045 = shalt.err (!%p2042_p9)
}
  0x32   :  { %s2079_s0 = smov 32   ;;  %s2080_s18 = smov 2  }
  0x33   :  { %48 = dma.hbm_to_vmem [thread:$0]  %s2293_s2, 320, %s43_s15, [#allocation6], %s2079_s0, %s2079_s0, %s2080_s18  }
  0x34   :  { %2068 = dma.done.wait [#allocation3], 128  }
  0x35   :  { %2069 = vsyncadd [#allocation3], 4294967168 }
  0x36   :  { %2070 = dma.done.wait [#allocation6], 10560  }
  0x37   :  { %2071 = vsyncadd [#allocation6], 4294956736  ;;  %v2081_v0 = vmov 0.0   ;;  %vm2082_vm0 = vmmov 0   ;;  %v1885_v1 = vld [vmem:[#allocation5] sm:$0xff]   ;;  %v1886_v2 = vld [vmem:[#allocation5 + $0x8] sm:$0xff]   ;;  %v170_v39 = vlaneseq }
  0x38   :  { %1681 = vmatprep.subr.bf16.mxu0 %v2081_v0  ;;  %1689 = vmatprep.mubr.msk.bf16.mxu0 %vm2082_vm0, %v2081_v0  ;;  %v1887_v3 = vld [vmem:[#allocation5 + $0x10] sm:$0xff]   ;;  %vm98_vm1 = vcmask 523264   ;;  %v1888_v4 = vld [vmem:[#allocation5 + $0x18] sm:$0xff]   ;;  %v1890_v6 = vld [vmem:[#allocation5 + $0x40] sm:$0xff]   ;;  %vm780_vm2 = vcmask 64512  }
  0x39   :  { %1693 = vmatprep.subr.bf16.mxu1 %v2081_v0  ;;  %1709 = vmatprep.mubr.msk.bf16.mxu1 %vm2082_vm0, %v2081_v0  ;;  %v1889_v5 = vld [vmem:[#allocation2] sm:$0xff]   ;;  %v1891_v7 = vld [vmem:[#allocation5 + $0x48] sm:$0xff]   ;;  %v1892_v8 = vld [vmem:[#allocation5 + $0x50] sm:$0xff]   ;;  %v171_v40 = vshrl.u32 %v170_v39, 7 }
  0x3a   :  { %1682 = vmatpush3.bf16.msra.mxu0 %v1885_v1  ;;  %1694 = vmatpush3.bf16.msra.mxu1 %v1890_v6  ;;  %v1893_v9 = vld [vmem:[#allocation5 + $0x58] sm:$0xff]   ;;  %v1894_v10 = vld [vmem:[#allocation5 + $0x60] sm:$0xff]   ;;  %v1895_v11 = vld [vmem:[#allocation5 + $0x68] sm:$0xff]  }
  0x3b   :  { %1683 = vmatprep.subr.bf16.mxu0 %v2081_v0  ;;  %1695 = vmatprep.subr.bf16.mxu1 %v2081_v0  ;;  %v1896_v12 = vld [vmem:[#allocation5 + $0x70] sm:$0xff]   ;;  %v1897_v13 = vld [vmem:[#allocation5 + $0x78] sm:$0xff]   ;;  %v143_v41 = vld [vmem:[#allocation7] sm:$0x1]  ;;  %v2175_v42 = vsub.s32 0, %v171_v40 }
  0x3c   :  { %v144_v45 = vld [vmem:[#allocation7 + $0x1] sm:$0x1]  ;;  %v1899_v58 = vld [vmem:[#allocation5 + $0x88] sm:$0xff]   ;;  %v1900_v59 = vld [vmem:[#allocation5 + $0x90] sm:$0xff]  }
  0x3d   :  { %v1898_v57 = vld [vmem:[#allocation5 + $0x80] sm:$0xff]   ;;  %v1901_v60 = vld [vmem:[#allocation5 + $0x98] sm:$0xff]   ;;  %v1903_v62 = vld [vmem:[#allocation5 + $0xa8] sm:$0xff]  }
  0x3e   :  { %1684 = vmatpush3.bf16.msra.mxu0 %v1886_v2  ;;  %1696 = vmatpush3.bf16.msra.mxu1 %v1891_v7  ;;  %v1902_v61 = vld [vmem:[#allocation5 + $0xa0] sm:$0xff]   ;;  %v1904_v63 = vld [vmem:[#allocation5 + $0xb0] sm:$0xff]   ;;  %v1905_v1 = vld [vmem:[#allocation5 + $0xb8] sm:$0xff]  }
  0x3f   :  { %1685 = vmatprep.subr.bf16.mxu0 %v2081_v0  ;;  %1697 = vmatprep.subr.bf16.mxu1 %v2081_v0 }
  0x42   :  { %1686 = vmatpush3.bf16.msra.mxu0 %v1887_v3  ;;  %1698 = vmatpush3.bf16.msra.mxu1 %v1892_v8 }
  0x43   :  { %1687 = vmatprep.subr.bf16.mxu0 %v2081_v0  ;;  %1699 = vmatprep.subr.bf16.mxu1 %v2081_v0 }
  0x46   :  { %1688 = vmatpush3.bf16.msra.mxu0 %v1888_v4  ;;  %1700 = vmatpush3.bf16.msra.mxu1 %v1893_v9 }
  0x47   :  { %1713 = vmatprep.subr.bf16.mxu0 %v2081_v0  ;;  %1701 = vmatprep.subr.bf16.mxu1 %v2081_v0 }
  0x49   :  { %1690 = vmatmul.mubr.msk.bf16.vlgmr.msra.gmra.mrb[0].mxu0 %vm98_vm1, %v1889_v5 }
  0x4a   :  { %1729 = vmatprep.mubr.msk.bf16.mxu0 %vm2082_vm0, %v2081_v0  ;;  %1702 = vmatpush3.bf16.msra.mxu1 %v1894_v10 }
  0x4b   :  { %1703 = vmatprep.subr.bf16.mxu1 %v2081_v0  ;;  %1714 = vmatpush3.bf16.msra.mxu0 %v1898_v57 }
  0x4c   :  { %1715 = vmatprep.subr.bf16.mxu0 %v2081_v0 }
  0x4e   :  { %1704 = vmatpush3.bf16.msra.mxu1 %v1895_v11 }
  0x4f   :  { %1705 = vmatprep.subr.bf16.mxu1 %v2081_v0  ;;  %1716 = vmatpush3.bf16.msra.mxu0 %v1899_v58 }
  0x50   :  { %1717 = vmatprep.subr.bf16.mxu0 %v2081_v0 }
  0x52   :  { %1706 = vmatpush3.bf16.msra.mxu1 %v1896_v12 }
  0x53   :  { %1707 = vmatprep.subr.bf16.mxu1 %v2081_v0  ;;  %1718 = vmatpush3.bf16.msra.mxu0 %v1900_v59 }
  0x54   :  { %1719 = vmatprep.subr.bf16.mxu0 %v2081_v0 }
  0x56   :  { %1708 = vmatpush3.bf16.msra.mxu1 %v1897_v13 }
  0x57   :  { %1733 = vmatprep.subr.bf16.mxu1 %v2081_v0  ;;  %1720 = vmatpush3.bf16.msra.mxu0 %v1901_v60 }
  0x58   :  { %1721 = vmatprep.subr.bf16.mxu0 %v2081_v0 }
  0x5b   :  { %1722 = vmatpush3.bf16.msra.mxu0 %v1902_v61 }
  0x5c   :  { %1723 = vmatprep.subr.bf16.mxu0 %v2081_v0 }
  0x5f   :  { %1724 = vmatpush3.bf16.msra.mxu0 %v1903_v62 }
  0x60   :  { %1725 = vmatprep.subr.bf16.mxu0 %v2081_v0 }
  0x63   :  { %1726 = vmatpush3.bf16.msra.mxu0 %v1904_v63 }
  0x64   :  { %1727 = vmatprep.subr.bf16.mxu0 %v2081_v0 }
  0x67   :  { %1728 = vmatpush3.bf16.msra.mxu0 %v1905_v1 }
  0x68   :  { %1753 = vmatprep.subr.bf16.mxu0 %v2081_v0 }
 0x11c   :  { %v136_v14 = vpop.f32.mrb[0].mxu0 }
 0x11d   :  { %v1691_v15 = vpop.f32.mrb[1].mxu0  ;;  %v153_v17 = vmul.f32 %v136_v14, %v136_v14 }
 0x11e   :  { %v139_v16 = vpop.f32.mrb[2].mxu0 }
 0x11f   :  { %v145_v18 = vadd.f32 %v139_v16, %v136_v14  ;;  %v154_v19 = vmul.f32 %v139_v16, %v139_v16  ;;  %v1692_v20 = vpop.f32.mrb[3].mxu0 }
 0x121   :  { %v146_v21 = vrot.slane %v145_v18, 4  ;;  %v155_v22 = vadd.f32 %v154_v19, %v153_v17 }
 0x123   :  { %v147_v23 = vadd.f32 %v146_v21, %v145_v18  ;;  %v156_v24 = vrot.slane %v155_v22, 4 }
 0x125   :  { %v148_v25 = vrot.slane %v147_v23, 2  ;;  %v157_v26 = vadd.f32 %v156_v24, %v155_v22 }
 0x127   :  { %v149_v27 = vadd.f32 %v148_v25, %v147_v23  ;;  %v158_v28 = vrot.slane %v157_v26, 2 }
 0x129   :  { %v150_v29 = vrot.slane %v149_v27, 1  ;;  %v159_v30 = vadd.f32 %v158_v28, %v157_v26 }
 0x12b   :  { %v151_v31 = vadd.f32 %v150_v29, %v149_v27  ;;  %v160_v32 = vrot.slane %v159_v30, 1  ;;  %v292_v27 = vld [vmem:[#allocation7 + $0x2] sm:$0x1] }
 0x12d   :  { %v152_v33 = vmul.f32 0.0625, %v151_v31  ;;  %v161_v34 = vadd.f32 %v160_v32, %v159_v30  ;;  %v293_v30 = vld [vmem:[#allocation7 + $0x3] sm:$0x1] }
 0x12f   :  { %v162_v35 = vmul.f32 0.0625, %v161_v34  ;;  %v163_v36 = vmul.f32 %v152_v33, %v152_v33 }
 0x131   :  { %v164_v37 = vsub.f32 %v162_v35, %v163_v36 }
 0x133   :  { %v165_v38 = vadd.f32 0.001, %v164_v37 }
 0x135   :  { %1962 = vrsqrt.f32 %v165_v38 }
 0x13f   :  { %v1963_v43 = vpop.eup %1962 }
 0x140   :  { %v167_v44 = vmul.f32 %v1963_v43, %v143_v41  ;;  %v1906_v43 = vld [vmem:[#allocation5 + $0xc0] sm:$0xff]  }
 0x142   :  { %v168_v46 = vmul.f32 %v167_v44, %v152_v33  ;;  %v173_v47 = vrot.slane %v167_v44, %v2175_v42  ;;  %v1907_v44 = vld [vmem:[#allocation5 + $0xc8] sm:$0xff]  }
 0x144   :  { %v169_v48 = vsub.f32 %v144_v45, %v168_v46  ;;  %v174_v49 = vmul.f32 %v173_v47, %v136_v14  ;;  %v175_v50 = vmul.f32 %v173_v47, %v139_v16  ;;  %v1908_v45 = vld [vmem:[#allocation5 + $0xd0] sm:$0xff]   ;;  %v1909_v46 = vld [vmem:[#allocation5 + $0xd8] sm:$0xff]   ;;  %v1910_v47 = vld [vmem:[#allocation5 + $0xe0] sm:$0xff]  }
 0x146   :  { %v179_v51 = vrot.slane %v169_v48, %v2175_v42  ;;  %v1911_v48 = vld [vmem:[#allocation5 + $0xe8] sm:$0xff]  }
 0x148   :  { %v181_v52 = vadd.f32 %v179_v51, %v175_v50  ;;  %v180_v53 = vadd.f32 %v179_v51, %v174_v49  ;;  %v1912_v49 = vld [vmem:[#allocation5 + $0xf0] sm:$0xff]   ;;  %v1913_v50 = vld [vmem:[#allocation5 + $0xf8] sm:$0xff]  }
 0x14a   :  { %v182_v54 = vmax.f32 %v180_v53, 0.0  ;;  %v183_v55 = vmax.f32 %v181_v52, 0.0 }
 0x14c   :  { %v184_v56 = vpack.c.bf16 %v183_v55, %v182_v54 }
 0x14e   :  { %1710 = vmatmul.mubr.bf16.vlgmr.msra.gmra.mrb[0].mxu1 %v184_v56 }
 0x14f   :  { %1749 = vmatprep.mubr.msk.bf16.mxu1 %vm2082_vm0, %v2081_v0  ;;  %1734 = vmatpush3.bf16.msra.mxu1 %v1906_v43 }
 0x150   :  { %1735 = vmatprep.subr.bf16.mxu1 %v2081_v0 }
 0x153   :  { %1736 = vmatpush3.bf16.msra.mxu1 %v1907_v44 }
 0x154   :  { %1737 = vmatprep.subr.bf16.mxu1 %v2081_v0 }
 0x157   :  { %1738 = vmatpush3.bf16.msra.mxu1 %v1908_v45 }
 0x158   :  { %1739 = vmatprep.subr.bf16.mxu1 %v2081_v0 }
 0x15b   :  { %1740 = vmatpush3.bf16.msra.mxu1 %v1909_v46 }
 0x15c   :  { %1741 = vmatprep.subr.bf16.mxu1 %v2081_v0 }
 0x15f   :  { %1742 = vmatpush3.bf16.msra.mxu1 %v1910_v47 }
 0x160   :  { %1743 = vmatprep.subr.bf16.mxu1 %v2081_v0 }
 0x163   :  { %1744 = vmatpush3.bf16.msra.mxu1 %v1911_v48 }
 0x164   :  { %1745 = vmatprep.subr.bf16.mxu1 %v2081_v0 }
 0x167   :  { %1746 = vmatpush3.bf16.msra.mxu1 %v1912_v49 }
 0x168   :  { %1747 = vmatprep.subr.bf16.mxu1 %v2081_v0 }
 0x16b   :  { %1748 = vmatpush3.bf16.msra.mxu1 %v1913_v50 }
 0x16c   :  { %1773 = vmatprep.subr.bf16.mxu1 %v2081_v0 }
 0x221   :  { %v284_v2 = vpop.f32.mrb[0].mxu1 }
 0x222   :  { %v1711_v3 = vpop.f32.mrb[1].mxu1  ;;  %v302_v5 = vmul.f32 %v284_v2, %v284_v2 }
 0x223   :  { %v287_v4 = vpop.f32.mrb[2].mxu1 }
 0x224   :  { %v294_v6 = vadd.f32 %v287_v4, %v284_v2  ;;  %v303_v7 = vmul.f32 %v287_v4, %v287_v4  ;;  %v1712_v8 = vpop.f32.mrb[3].mxu1 }
 0x226   :  { %v295_v9 = vrot.slane %v294_v6, 4  ;;  %v304_v10 = vadd.f32 %v303_v7, %v302_v5 }
 0x228   :  { %v296_v11 = vadd.f32 %v295_v9, %v294_v6  ;;  %v305_v12 = vrot.slane %v304_v10, 4 }
 0x22a   :  { %v297_v13 = vrot.slane %v296_v11, 2  ;;  %v306_v14 = vadd.f32 %v305_v12, %v304_v10 }
 0x22c   :  { %v298_v15 = vadd.f32 %v297_v13, %v296_v11  ;;  %v307_v16 = vrot.slane %v306_v14, 2  ;;  %v441_v13 = vld [vmem:[#allocation7 + $0x4] sm:$0x1] }
 0x22e   :  { %v299_v17 = vrot.slane %v298_v15, 1  ;;  %v308_v18 = vadd.f32 %v307_v16, %v306_v14  ;;  %v442_v16 = vld [vmem:[#allocation7 + $0x5] sm:$0x1] }
 0x230   :  { %v300_v19 = vadd.f32 %v299_v17, %v298_v15  ;;  %v309_v20 = vrot.slane %v308_v18, 1 }
 0x232   :  { %v301_v21 = vmul.f32 0.0625, %v300_v19  ;;  %v310_v22 = vadd.f32 %v309_v20, %v308_v18 }
 0x234   :  { %v311_v23 = vmul.f32 0.0625, %v310_v22  ;;  %v312_v24 = vmul.f32 %v301_v21, %v301_v21 }
 0x236   :  { %v313_v25 = vsub.f32 %v311_v23, %v312_v24 }
 0x238   :  { %v314_v26 = vadd.f32 0.001, %v313_v25 }
 0x23a   :  { %1964 = vrsqrt.f32 %v314_v26 }
 0x244   :  { %v1965_v28 = vpop.eup %1964 }
 0x245   :  { %v316_v29 = vmul.f32 %v1965_v28, %v292_v27  ;;  %v1914_v28 = vld [vmem:[#allocation5 + $0x100] sm:$0xff]  }
 0x247   :  { %v317_v31 = vmul.f32 %v316_v29, %v301_v21  ;;  %v322_v32 = vrot.slane %v316_v29, %v2175_v42  ;;  %v1915_v29 = vld [vmem:[#allocation5 + $0x108] sm:$0xff]  }
 0x249   :  { %v318_v33 = vsub.f32 %v293_v30, %v317_v31  ;;  %v323_v34 = vmul.f32 %v322_v32, %v284_v2  ;;  %v324_v35 = vmul.f32 %v322_v32, %v287_v4  ;;  %v1916_v30 = vld [vmem:[#allocation5 + $0x110] sm:$0xff]   ;;  %v1917_v31 = vld [vmem:[#allocation5 + $0x118] sm:$0xff]   ;;  %v1918_v32 = vld [vmem:[#allocation5 + $0x120] sm:$0xff]  }
 0x24b   :  { %v328_v36 = vrot.slane %v318_v33, %v2175_v42  ;;  %v1919_v33 = vld [vmem:[#allocation5 + $0x128] sm:$0xff]  }
 0x24d   :  { %v329_v37 = vadd.f32 %v328_v36, %v323_v34  ;;  %v330_v38 = vadd.f32 %v328_v36, %v324_v35  ;;  %v1920_v34 = vld [vmem:[#allocation5 + $0x130] sm:$0xff]   ;;  %v1921_v35 = vld [vmem:[#allocation5 + $0x138] sm:$0xff]  }
 0x24f   :  { %v332_v39 = vmax.f32 %v330_v38, 0.0  ;;  %v331_v40 = vmax.f32 %v329_v37, 0.0 }
 0x251   :  { %v333_v41 = vpack.c.bf16 %v332_v39, %v331_v40 }
 0x253   :  { %1730 = vmatmul.mubr.bf16.vlgmr.msra.gmra.mrb[4].mxu0 %v333_v41 }
 0x254   :  { %1769 = vmatprep.mubr.msk.bf16.mxu0 %vm2082_vm0, %v2081_v0  ;;  %1754 = vmatpush3.bf16.msra.mxu0 %v1914_v28 }
 0x255   :  { %1755 = vmatprep.subr.bf16.mxu0 %v2081_v0 }
 0x258   :  { %1756 = vmatpush3.bf16.msra.mxu0 %v1915_v29 }
 0x259   :  { %1757 = vmatprep.subr.bf16.mxu0 %v2081_v0 }
 0x25c   :  { %1758 = vmatpush3.bf16.msra.mxu0 %v1916_v30 }
 0x25d   :  { %1759 = vmatprep.subr.bf16.mxu0 %v2081_v0 }
 0x260   :  { %1760 = vmatpush3.bf16.msra.mxu0 %v1917_v31 }
 0x261   :  { %1761 = vmatprep.subr.bf16.mxu0 %v2081_v0 }
 0x264   :  { %1762 = vmatpush3.bf16.msra.mxu0 %v1918_v32 }
 0x265   :  { %1763 = vmatprep.subr.bf16.mxu0 %v2081_v0 }
 0x268   :  { %1764 = vmatpush3.bf16.msra.mxu0 %v1919_v33 }
 0x269   :  { %1765 = vmatprep.subr.bf16.mxu0 %v2081_v0 }
 0x26c   :  { %1766 = vmatpush3.bf16.msra.mxu0 %v1920_v34 }
 0x26d   :  { %1767 = vmatprep.subr.bf16.mxu0 %v2081_v0 }
 0x270   :  { %1768 = vmatpush3.bf16.msra.mxu0 %v1921_v35 }
 0x271   :  { %1793 = vmatprep.subr.bf16.mxu0 %v2081_v0 }
 0x326   :  { %v433_v51 = vpop.f32.mrb[4].mxu0 }
 0x327   :  { %v1731_v52 = vpop.f32.mrb[5].mxu0  ;;  %v451_v54 = vmul.f32 %v433_v51, %v433_v51 }
 0x328   :  { %v436_v53 = vpop.f32.mrb[6].mxu0 }
 0x329   :  { %v443_v55 = vadd.f32 %v436_v53, %v433_v51  ;;  %v452_v56 = vmul.f32 %v436_v53, %v436_v53  ;;  %v1732_v57 = vpop.f32.mrb[7].mxu0 }
 0x32b   :  { %v444_v58 = vrot.slane %v443_v55, 4  ;;  %v453_v59 = vadd.f32 %v452_v56, %v451_v54 }
 0x32d   :  { %v445_v60 = vadd.f32 %v444_v58, %v443_v55  ;;  %v454_v61 = vrot.slane %v453_v59, 4 }
 0x32f   :  { %v446_v62 = vrot.slane %v445_v60, 2  ;;  %v455_v63 = vadd.f32 %v454_v61, %v453_v59 }
 0x331   :  { %v447_v1 = vadd.f32 %v446_v62, %v445_v60  ;;  %v456_v2 = vrot.slane %v455_v63, 2  ;;  %v590_v62 = vld [vmem:[#allocation7 + $0x6] sm:$0x1] }
 0x333   :  { %v448_v3 = vrot.slane %v447_v1, 1  ;;  %v457_v4 = vadd.f32 %v456_v2, %v455_v63  ;;  %v591_v2 = vld [vmem:[#allocation7 + $0x7] sm:$0x1] }
 0x335   :  { %v449_v5 = vadd.f32 %v448_v3, %v447_v1  ;;  %v458_v6 = vrot.slane %v457_v4, 1 }
 0x337   :  { %v450_v7 = vmul.f32 0.0625, %v449_v5  ;;  %v459_v8 = vadd.f32 %v458_v6, %v457_v4 }
 0x339   :  { %v460_v9 = vmul.f32 0.0625, %v459_v8  ;;  %v461_v10 = vmul.f32 %v450_v7, %v450_v7 }
 0x33b   :  { %v462_v11 = vsub.f32 %v460_v9, %v461_v10 }
 0x33d   :  { %v463_v12 = vadd.f32 0.001, %v462_v11 }
 0x33f   :  { %1966 = vrsqrt.f32 %v463_v12 }
 0x349   :  { %v1967_v14 = vpop.eup %1966 }
 0x34a   :  { %v465_v15 = vmul.f32 %v1967_v14, %v441_v13  ;;  %v1922_v14 = vld [vmem:[#allocation5 + $0x140] sm:$0xff]  }
 0x34c   :  { %v466_v17 = vmul.f32 %v465_v15, %v450_v7  ;;  %v471_v18 = vrot.slane %v465_v15, %v2175_v42  ;;  %v1923_v15 = vld [vmem:[#allocation5 + $0x148] sm:$0xff]  }
 0x34e   :  { %v467_v19 = vsub.f32 %v442_v16, %v466_v17  ;;  %v472_v20 = vmul.f32 %v471_v18, %v433_v51  ;;  %v473_v21 = vmul.f32 %v471_v18, %v436_v53  ;;  %v1924_v16 = vld [vmem:[#allocation5 + $0x150] sm:$0xff]   ;;  %v1925_v17 = vld [vmem:[#allocation5 + $0x158] sm:$0xff]   ;;  %v1926_v18 = vld [vmem:[#allocation5 + $0x160] sm:$0xff]  }
 0x350   :  { %v477_v22 = vrot.slane %v467_v19, %v2175_v42  ;;  %v1927_v19 = vld [vmem:[#allocation5 + $0x168] sm:$0xff]  }
 0x352   :  { %v478_v23 = vadd.f32 %v477_v22, %v472_v20  ;;  %v479_v24 = vadd.f32 %v477_v22, %v473_v21  ;;  %v1928_v20 = vld [vmem:[#allocation5 + $0x170] sm:$0xff]   ;;  %v1929_v21 = vld [vmem:[#allocation5 + $0x178] sm:$0xff]  }
 0x354   :  { %v481_v25 = vmax.f32 %v479_v24, 0.0  ;;  %v480_v26 = vmax.f32 %v478_v23, 0.0 }
 0x356   :  { %v482_v27 = vpack.c.bf16 %v481_v25, %v480_v26 }
 0x358   :  { %1750 = vmatmul.mubr.bf16.vlgmr.msra.gmra.mrb[4].mxu1 %v482_v27 }
 0x359   :  { %1789 = vmatprep.mubr.msk.bf16.mxu1 %vm2082_vm0, %v2081_v0  ;;  %1774 = vmatpush3.bf16.msra.mxu1 %v1922_v14 }
 0x35a   :  { %1775 = vmatprep.subr.bf16.mxu1 %v2081_v0 }
 0x35d   :  { %1776 = vmatpush3.bf16.msra.mxu1 %v1923_v15 }
 0x35e   :  { %1777 = vmatprep.subr.bf16.mxu1 %v2081_v0 }
 0x361   :  { %1778 = vmatpush3.bf16.msra.mxu1 %v1924_v16 }
 0x362   :  { %1779 = vmatprep.subr.bf16.mxu1 %v2081_v0 }
 0x365   :  { %1780 = vmatpush3.bf16.msra.mxu1 %v1925_v17 }
 0x366   :  { %1781 = vmatprep.subr.bf16.mxu1 %v2081_v0 }
 0x369   :  { %1782 = vmatpush3.bf16.msra.mxu1 %v1926_v18 }
 0x36a   :  { %1783 = vmatprep.subr.bf16.mxu1 %v2081_v0 }
 0x36d   :  { %1784 = vmatpush3.bf16.msra.mxu1 %v1927_v19 }
 0x36e   :  { %1785 = vmatprep.subr.bf16.mxu1 %v2081_v0 }
 0x371   :  { %1786 = vmatpush3.bf16.msra.mxu1 %v1928_v20 }
 0x372   :  { %1787 = vmatprep.subr.bf16.mxu1 %v2081_v0 }
 0x375   :  { %1788 = vmatpush3.bf16.msra.mxu1 %v1929_v21 }
 0x376   :  { %1813 = vmatprep.subr.bf16.mxu1 %v2081_v0 }
 0x42b   :  { %v582_v36 = vpop.f32.mrb[4].mxu1 }
 0x42c   :  { %v1751_v37 = vpop.f32.mrb[5].mxu1  ;;  %v600_v39 = vmul.f32 %v582_v36, %v582_v36 }
 0x42d   :  { %v585_v38 = vpop.f32.mrb[6].mxu1 }
 0x42e   :  { %v592_v40 = vadd.f32 %v585_v38, %v582_v36  ;;  %v601_v41 = vmul.f32 %v585_v38, %v585_v38  ;;  %v1752_v43 = vpop.f32.mrb[7].mxu1 }
 0x430   :  { %v593_v44 = vrot.slane %v592_v40, 4  ;;  %v602_v45 = vadd.f32 %v601_v41, %v600_v39 }
 0x432   :  { %v594_v46 = vadd.f32 %v593_v44, %v592_v40  ;;  %v603_v47 = vrot.slane %v602_v45, 4 }
 0x434   :  { %v595_v48 = vrot.slane %v594_v46, 2  ;;  %v604_v49 = vadd.f32 %v603_v47, %v602_v45 }
 0x436   :  { %v596_v50 = vadd.f32 %v595_v48, %v594_v46  ;;  %v605_v51 = vrot.slane %v604_v49, 2  ;;  %v739_v48 = vld [vmem:[#allocation7 + $0x8] sm:$0x1] }
 0x438   :  { %v597_v52 = vrot.slane %v596_v50, 1  ;;  %v606_v53 = vadd.f32 %v605_v51, %v604_v49  ;;  %v740_v51 = vld [vmem:[#allocation7 + $0x9] sm:$0x1] }
 0x43a   :  { %v598_v54 = vadd.f32 %v597_v52, %v596_v50  ;;  %v607_v55 = vrot.slane %v606_v53, 1 }
 0x43c   :  { %v599_v56 = vmul.f32 0.0625, %v598_v54  ;;  %v608_v57 = vadd.f32 %v607_v55, %v606_v53 }
 0x43e   :  { %v609_v58 = vmul.f32 0.0625, %v608_v57  ;;  %v610_v59 = vmul.f32 %v599_v56, %v599_v56 }
 0x440   :  { %v611_v60 = vsub.f32 %v609_v58, %v610_v59 }
 0x442   :  { %v612_v61 = vadd.f32 0.001, %v611_v60 }
 0x444   :  { %1968 = vrsqrt.f32 %v612_v61 }
 0x44e   :  { %v1969_v63 = vpop.eup %1968 }
 0x44f   :  { %v614_v1 = vmul.f32 %v1969_v63, %v590_v62  ;;  %v1930_v63 = vld [vmem:[#allocation5 + $0x180] sm:$0xff]  }
 0x451   :  { %v615_v3 = vmul.f32 %v614_v1, %v599_v56  ;;  %v620_v4 = vrot.slane %v614_v1, %v2175_v42  ;;  %v1931_v1 = vld [vmem:[#allocation5 + $0x188] sm:$0xff]  }
 0x453   :  { %v616_v5 = vsub.f32 %v591_v2, %v615_v3  ;;  %v621_v6 = vmul.f32 %v620_v4, %v582_v36  ;;  %v622_v7 = vmul.f32 %v620_v4, %v585_v38  ;;  %v1932_v2 = vld [vmem:[#allocation5 + $0x190] sm:$0xff]   ;;  %v1933_v3 = vld [vmem:[#allocation5 + $0x198] sm:$0xff]   ;;  %v1934_v4 = vld [vmem:[#allocation5 + $0x1a0] sm:$0xff]  }
 0x455   :  { %v626_v8 = vrot.slane %v616_v5, %v2175_v42  ;;  %v1935_v5 = vld [vmem:[#allocation5 + $0x1a8] sm:$0xff]  }
 0x457   :  { %v627_v9 = vadd.f32 %v626_v8, %v621_v6  ;;  %v628_v10 = vadd.f32 %v626_v8, %v622_v7  ;;  %v1936_v6 = vld [vmem:[#allocation5 + $0x1b0] sm:$0xff]   ;;  %v1937_v7 = vld [vmem:[#allocation5 + $0x1b8] sm:$0xff]  }
 0x459   :  { %v630_v11 = vmax.f32 %v628_v10, 0.0  ;;  %v629_v12 = vmax.f32 %v627_v9, 0.0 }
 0x45b   :  { %v631_v13 = vpack.c.bf16 %v630_v11, %v629_v12 }
 0x45d   :  { %1770 = vmatmul.mubr.bf16.vlgmr.msra.gmra.mrb[8].mxu0 %v631_v13 }
 0x45e   :  { %1809 = vmatprep.mubr.msk.bf16.mxu0 %vm2082_vm0, %v2081_v0  ;;  %1794 = vmatpush3.bf16.msra.mxu0 %v1930_v63 }
 0x45f   :  { %1795 = vmatprep.subr.bf16.mxu0 %v2081_v0 }
 0x462   :  { %1796 = vmatpush3.bf16.msra.mxu0 %v1931_v1 }
 0x463   :  { %1797 = vmatprep.subr.bf16.mxu0 %v2081_v0 }
 0x466   :  { %1798 = vmatpush3.bf16.msra.mxu0 %v1932_v2 }
 0x467   :  { %1799 = vmatprep.subr.bf16.mxu0 %v2081_v0 }
 0x46a   :  { %1800 = vmatpush3.bf16.msra.mxu0 %v1933_v3 }
 0x46b   :  { %1801 = vmatprep.subr.bf16.mxu0 %v2081_v0 }
 0x46e   :  { %1802 = vmatpush3.bf16.msra.mxu0 %v1934_v4 }
 0x46f   :  { %1803 = vmatprep.subr.bf16.mxu0 %v2081_v0 }
 0x472   :  { %1804 = vmatpush3.bf16.msra.mxu0 %v1935_v5 }
 0x473   :  { %1805 = vmatprep.subr.bf16.mxu0 %v2081_v0 }
 0x476   :  { %1806 = vmatpush3.bf16.msra.mxu0 %v1936_v6 }
 0x477   :  { %1807 = vmatprep.subr.bf16.mxu0 %v2081_v0 }
 0x47a   :  { %1808 = vmatpush3.bf16.msra.mxu0 %v1937_v7 }
 0x47b   :  { %1833 = vmatprep.subr.bf16.mxu0 %v2081_v0 }
 0x530   :  { %v731_v22 = vpop.f32.mrb[8].mxu0 }
 0x531   :  { %v1771_v23 = vpop.f32.mrb[9].mxu0  ;;  %v749_v25 = vmul.f32 %v731_v22, %v731_v22 }
 0x532   :  { %v734_v24 = vpop.f32.mrb[10].mxu0 }
 0x533   :  { %v741_v26 = vadd.f32 %v734_v24, %v731_v22  ;;  %v750_v27 = vmul.f32 %v734_v24, %v734_v24  ;;  %v1772_v28 = vpop.f32.mrb[11].mxu0 }
 0x535   :  { %v742_v29 = vrot.slane %v741_v26, 4  ;;  %v751_v30 = vadd.f32 %v750_v27, %v749_v25 }
 0x537   :  { %v743_v31 = vadd.f32 %v742_v29, %v741_v26  ;;  %v752_v32 = vrot.slane %v751_v30, 4 }
 0x539   :  { %v744_v33 = vrot.slane %v743_v31, 2  ;;  %v753_v34 = vadd.f32 %v752_v32, %v751_v30 }
 0x53b   :  { %v745_v35 = vadd.f32 %v744_v33, %v743_v31  ;;  %v754_v36 = vrot.slane %v753_v34, 2  ;;  %v891_v33 = vld [vmem:[#allocation7 + $0xa] sm:$0x1] }
 0x53d   :  { %v746_v37 = vrot.slane %v745_v35, 1  ;;  %v755_v38 = vadd.f32 %v754_v36, %v753_v34  ;;  %v892_v36 = vld [vmem:[#allocation7 + $0xb] sm:$0x1] }
 0x53f   :  { %v747_v39 = vadd.f32 %v746_v37, %v745_v35  ;;  %v756_v40 = vrot.slane %v755_v38, 1 }
 0x541   :  { %v748_v41 = vmul.f32 0.0625, %v747_v39  ;;  %v757_v43 = vadd.f32 %v756_v40, %v755_v38 }
 0x543   :  { %v758_v44 = vmul.f32 0.0625, %v757_v43  ;;  %v759_v45 = vmul.f32 %v748_v41, %v748_v41 }
 0x545   :  { %v760_v46 = vsub.f32 %v758_v44, %v759_v45 }
 0x547   :  { %v761_v47 = vadd.f32 0.001, %v760_v46 }
 0x549   :  { %1970 = vrsqrt.f32 %v761_v47 }
 0x553   :  { %v1971_v49 = vpop.eup %1970 }
 0x554   :  { %v763_v50 = vmul.f32 %v1971_v49, %v739_v48  ;;  %v1938_v49 = vld [vmem:[#allocation5 + $0x1c0] sm:$0xff]  }
 0x556   :  { %v764_v52 = vmul.f32 %v763_v50, %v748_v41  ;;  %v769_v53 = vrot.slane %v763_v50, %v2175_v42  ;;  %v1939_v50 = vld [vmem:[#allocation5 + $0x1c8] sm:$0xff]  }
 0x558   :  { %v765_v54 = vsub.f32 %v740_v51, %v764_v52  ;;  %v770_v55 = vmul.f32 %v769_v53, %v731_v22  ;;  %v771_v56 = vmul.f32 %v769_v53, %v734_v24  ;;  %v1940_v51 = vld [vmem:[#allocation5 + $0x1d0] sm:$0xff]   ;;  %v1941_v52 = vld [vmem:[#allocation5 + $0x1d8] sm:$0xff]   ;;  %v1942_v53 = vld [vmem:[#allocation5 + $0x1e0] sm:$0xff]  }
 0x55a   :  { %v775_v57 = vrot.slane %v765_v54, %v2175_v42  ;;  %v1943_v54 = vld [vmem:[#allocation5 + $0x1e8] sm:$0xff]  }
 0x55c   :  { %v776_v58 = vadd.f32 %v775_v57, %v770_v55  ;;  %v777_v59 = vadd.f32 %v775_v57, %v771_v56  ;;  %v1944_v55 = vld [vmem:[#allocation5 + $0x1f0] sm:$0xff]   ;;  %v1945_v56 = vld [vmem:[#allocation5 + $0x1f8] sm:$0xff]  }
 0x55e   :  { %v779_v60 = vmax.f32 %v777_v59, 0.0  ;;  %v778_v61 = vmax.f32 %v776_v58, 0.0 }
 0x560   :  { %782 = vst.msk [vmem:[%s2295_s4 + $0x8] sm:$0xff] %vm780_vm2, %v779_v60  ;;  %781 = vst.msk [vmem:[%s2295_s4] sm:$0xff] %vm780_vm2, %v778_v61  ;;  %v783_v62 = vpack.c.bf16 %v779_v60, %v778_v61  ;;  %s2083_s4 = smov [#allocation8]  }
 0x561   :  { %s1499_s30 = sshll.u32 %s2083_s4, 4  ;;  %s1500_s30 = int_to_ptr.vmem [resolvable:$true] %s1499_s30 }
 0x562   :  { %1790 = vmatmul.mubr.bf16.vlgmr.msra.gmra.mrb[8].mxu1 %v783_v62  ;;  %s2046_s5 = scalar_lea.vmem %s1500_s30, 256  ;;  %p2051_p11 = scmp.lt.s32.totalorder %s1500_s30, %s1500_s30 }
 0x563   :  { %1829 = vmatprep.mubr.msk.bf16.mxu1 %vm2082_vm0, %v2081_v0  ;;  %1814 = vmatpush3.bf16.msra.mxu1 %v1938_v49  ;;  %p2047_p10 = scmp.ne.s32.totalorder %s1500_s30, %s2046_s5  ;;  %p2052_p12 = scmp.lt.s32.totalorder %s2046_s5, %s2046_s5 }
 0x564   :  { %1815 = vmatprep.subr.bf16.mxu1 %v2081_v0 }
 0x565   :  { %p2053_p13 = por %p2052_p12, %p2051_p11 }
 0x567   :  { %1816 = vmatpush3.bf16.msra.mxu1 %v1939_v50  ;;  %p2054_p0 = pnand %p2053_p13, %p2047_p10 }
 0x568   :  { %1817 = vmatprep.subr.bf16.mxu1 %v2081_v0 }
 0x56b   :  { %1818 = vmatpush3.bf16.msra.mxu1 %v1940_v51 }
 0x56c   :  { %1819 = vmatprep.subr.bf16.mxu1 %v2081_v0 }
 0x56f   :  { %1820 = vmatpush3.bf16.msra.mxu1 %v1941_v52 }
 0x570   :  { %1821 = vmatprep.subr.bf16.mxu1 %v2081_v0 }
 0x573   :  { %1822 = vmatpush3.bf16.msra.mxu1 %v1942_v53 }
 0x574   :  { %1823 = vmatprep.subr.bf16.mxu1 %v2081_v0 }
 0x577   :  { %1824 = vmatpush3.bf16.msra.mxu1 %v1943_v54 }
 0x578   :  { %1825 = vmatprep.subr.bf16.mxu1 %v2081_v0 }
 0x57b   :  { %1826 = vmatpush3.bf16.msra.mxu1 %v1944_v55 }
 0x57c   :  { %1827 = vmatprep.subr.bf16.mxu1 %v2081_v0 }
 0x57f   :  { %1828 = vmatpush3.bf16.msra.mxu1 %v1945_v56 }
 0x580   :  { %1853 = vmatprep.subr.bf16.mxu1 %v2081_v0 }
 0x635   :  { %v883_v8 = vpop.f32.mrb[8].mxu1 }
 0x636   :  { %v1791_v9 = vpop.f32.mrb[9].mxu1  ;;  %v901_v11 = vmul.f32 %v883_v8, %v883_v8 }
 0x637   :  { %v886_v10 = vpop.f32.mrb[10].mxu1 }
 0x638   :  { %v893_v12 = vadd.f32 %v886_v10, %v883_v8  ;;  %v902_v13 = vmul.f32 %v886_v10, %v886_v10  ;;  %v1792_v14 = vpop.f32.mrb[11].mxu1 }
 0x63a   :  { %v894_v15 = vrot.slane %v893_v12, 4  ;;  %v903_v16 = vadd.f32 %v902_v13, %v901_v11 }
 0x63c   :  { %v895_v17 = vadd.f32 %v894_v15, %v893_v12  ;;  %v904_v18 = vrot.slane %v903_v16, 4 }
 0x63e   :  { %v896_v19 = vrot.slane %v895_v17, 2  ;;  %v905_v20 = vadd.f32 %v904_v18, %v903_v16 }
 0x640   :  { %v897_v21 = vadd.f32 %v896_v19, %v895_v17  ;;  %v906_v22 = vrot.slane %v905_v20, 2  ;;  %v1040_v19 = vld [vmem:[#allocation7 + $0xc] sm:$0x1] }
 0x642   :  { %v898_v23 = vrot.slane %v897_v21, 1  ;;  %v907_v24 = vadd.f32 %v906_v22, %v905_v20  ;;  %v1041_v22 = vld [vmem:[#allocation7 + $0xd] sm:$0x1] }
 0x644   :  { %v899_v25 = vadd.f32 %v898_v23, %v897_v21  ;;  %v908_v26 = vrot.slane %v907_v24, 1 }
 0x646   :  { %v900_v27 = vmul.f32 0.0625, %v899_v25  ;;  %v909_v28 = vadd.f32 %v908_v26, %v907_v24 }
 0x648   :  { %v910_v29 = vmul.f32 0.0625, %v909_v28  ;;  %v911_v30 = vmul.f32 %v900_v27, %v900_v27 }
 0x64a   :  { %v912_v31 = vsub.f32 %v910_v29, %v911_v30 }
 0x64c   :  { %v913_v32 = vadd.f32 0.001, %v912_v31 }
 0x64e   :  { %1972 = vrsqrt.f32 %v913_v32 }
 0x658   :  { %v1973_v34 = vpop.eup %1972 }
 0x659   :  { %v915_v35 = vmul.f32 %v1973_v34, %v891_v33  ;;  %v1946_v34 = vld [vmem:[#allocation5 + $0x200] sm:$0xff]  }
 0x65b   :  { %v916_v37 = vmul.f32 %v915_v35, %v900_v27  ;;  %v921_v38 = vrot.slane %v915_v35, %v2175_v42  ;;  %v1947_v35 = vld [vmem:[#allocation5 + $0x208] sm:$0xff]  }
 0x65d   :  { %v917_v39 = vsub.f32 %v892_v36, %v916_v37  ;;  %v922_v40 = vmul.f32 %v921_v38, %v883_v8  ;;  %v923_v41 = vmul.f32 %v921_v38, %v886_v10  ;;  %v1948_v36 = vld [vmem:[#allocation5 + $0x210] sm:$0xff]   ;;  %v1949_v37 = vld [vmem:[#allocation5 + $0x218] sm:$0xff]   ;;  %v1950_v38 = vld [vmem:[#allocation5 + $0x220] sm:$0xff]  }
 0x65f   :  { %v927_v43 = vrot.slane %v917_v39, %v2175_v42  ;;  %v1951_v39 = vld [vmem:[#allocation5 + $0x228] sm:$0xff]  }
 0x661   :  { %v928_v44 = vadd.f32 %v927_v43, %v922_v40  ;;  %v929_v45 = vadd.f32 %v927_v43, %v923_v41  ;;  %v1952_v40 = vld [vmem:[#allocation5 + $0x230] sm:$0xff]   ;;  %v1953_v41 = vld [vmem:[#allocation5 + $0x238] sm:$0xff]  }
 0x663   :  { %v931_v46 = vmax.f32 %v929_v45, 0.0  ;;  %v930_v47 = vmax.f32 %v928_v44, 0.0 }
 0x665   :  { %v932_v48 = vpack.c.bf16 %v931_v46, %v930_v47 }
 0x667   :  { %1810 = vmatmul.mubr.bf16.vlgmr.msra.gmra.mrb[12].mxu0 %v932_v48 }
 0x668   :  { %1849 = vmatprep.mubr.msk.bf16.mxu0 %vm2082_vm0, %v2081_v0  ;;  %1834 = vmatpush3.bf16.msra.mxu0 %v1946_v34 }
 0x669   :  { %1835 = vmatprep.subr.bf16.mxu0 %v2081_v0 }
 0x66c   :  { %1836 = vmatpush3.bf16.msra.mxu0 %v1947_v35 }
 0x66d   :  { %1837 = vmatprep.subr.bf16.mxu0 %v2081_v0 }
 0x670   :  { %1838 = vmatpush3.bf16.msra.mxu0 %v1948_v36 }
 0x671   :  { %1839 = vmatprep.subr.bf16.mxu0 %v2081_v0 }
 0x674   :  { %1840 = vmatpush3.bf16.msra.mxu0 %v1949_v37 }
 0x675   :  { %1841 = vmatprep.subr.bf16.mxu0 %v2081_v0 }
 0x678   :  { %1842 = vmatpush3.bf16.msra.mxu0 %v1950_v38 }
 0x679   :  { %1843 = vmatprep.subr.bf16.mxu0 %v2081_v0 }
 0x67c   :  { %1844 = vmatpush3.bf16.msra.mxu0 %v1951_v39 }
 0x67d   :  { %1845 = vmatprep.subr.bf16.mxu0 %v2081_v0 }
 0x680   :  { %1846 = vmatpush3.bf16.msra.mxu0 %v1952_v40 }
 0x681   :  { %1847 = vmatprep.subr.bf16.mxu0 %v2081_v0 }
 0x684   :  { %1848 = vmatpush3.bf16.msra.mxu0 %v1953_v41 }
 0x73a   :  { %v1032_v57 = vpop.f32.mrb[12].mxu0 }
 0x73b   :  { %v1811_v58 = vpop.f32.mrb[13].mxu0  ;;  %v1050_v60 = vmul.f32 %v1032_v57, %v1032_v57 }
 0x73c   :  { %v1035_v59 = vpop.f32.mrb[14].mxu0 }
 0x73d   :  { %v1042_v61 = vadd.f32 %v1035_v59, %v1032_v57  ;;  %v1051_v62 = vmul.f32 %v1035_v59, %v1035_v59  ;;  %v1812_v63 = vpop.f32.mrb[15].mxu0 }
 0x73f   :  { %v1043_v1 = vrot.slane %v1042_v61, 4  ;;  %v1052_v2 = vadd.f32 %v1051_v62, %v1050_v60 }
 0x741   :  { %v1044_v3 = vadd.f32 %v1043_v1, %v1042_v61  ;;  %v1053_v4 = vrot.slane %v1052_v2, 4 }
 0x743   :  { %v1045_v5 = vrot.slane %v1044_v3, 2  ;;  %v1054_v6 = vadd.f32 %v1053_v4, %v1052_v2 }
 0x745   :  { %v1046_v7 = vadd.f32 %v1045_v5, %v1044_v3  ;;  %v1055_v8 = vrot.slane %v1054_v6, 2  ;;  %v1189_v5 = vld [vmem:[#allocation7 + $0xe] sm:$0x1] }
 0x747   :  { %v1047_v9 = vrot.slane %v1046_v7, 1  ;;  %v1056_v10 = vadd.f32 %v1055_v8, %v1054_v6  ;;  %v1190_v8 = vld [vmem:[#allocation7 + $0xf] sm:$0x1] }
 0x749   :  { %v1048_v11 = vadd.f32 %v1047_v9, %v1046_v7  ;;  %v1057_v12 = vrot.slane %v1056_v10, 1 }
 0x74b   :  { %v1049_v13 = vmul.f32 0.0625, %v1048_v11  ;;  %v1058_v14 = vadd.f32 %v1057_v12, %v1056_v10 }
 0x74d   :  { %v1059_v15 = vmul.f32 0.0625, %v1058_v14  ;;  %v1060_v16 = vmul.f32 %v1049_v13, %v1049_v13 }
 0x74f   :  { %v1061_v17 = vsub.f32 %v1059_v15, %v1060_v16 }
 0x751   :  { %v1062_v18 = vadd.f32 0.001, %v1061_v17 }
 0x753   :  { %1974 = vrsqrt.f32 %v1062_v18 }
 0x75d   :  { %v1975_v20 = vpop.eup %1974 }
 0x75e   :  { %v1064_v21 = vmul.f32 %v1975_v20, %v1040_v19  ;;  %v1954_v20 = vld [vmem:[#allocation5 + $0x240] sm:$0xff]  }
 0x760   :  { %v1065_v23 = vmul.f32 %v1064_v21, %v1049_v13  ;;  %v1070_v24 = vrot.slane %v1064_v21, %v2175_v42  ;;  %v1955_v21 = vld [vmem:[#allocation5 + $0x248] sm:$0xff]  }
 0x762   :  { %v1066_v25 = vsub.f32 %v1041_v22, %v1065_v23  ;;  %v1071_v26 = vmul.f32 %v1070_v24, %v1032_v57  ;;  %v1072_v27 = vmul.f32 %v1070_v24, %v1035_v59  ;;  %v1956_v22 = vld [vmem:[#allocation5 + $0x250] sm:$0xff]   ;;  %v1957_v23 = vld [vmem:[#allocation5 + $0x258] sm:$0xff]   ;;  %v1958_v24 = vld [vmem:[#allocation5 + $0x260] sm:$0xff]  }
 0x764   :  { %v1076_v28 = vrot.slane %v1066_v25, %v2175_v42  ;;  %v1959_v25 = vld [vmem:[#allocation5 + $0x268] sm:$0xff]  }
 0x766   :  { %v1077_v29 = vadd.f32 %v1076_v28, %v1071_v26  ;;  %v1078_v30 = vadd.f32 %v1076_v28, %v1072_v27  ;;  %v1960_v26 = vld [vmem:[#allocation5 + $0x270] sm:$0xff]   ;;  %v1961_v27 = vld [vmem:[#allocation5 + $0x278] sm:$0xff]  }
 0x768   :  { %v1080_v31 = vmax.f32 %v1078_v30, 0.0  ;;  %v1079_v32 = vmax.f32 %v1077_v29, 0.0 }
 0x76a   :  { %v1081_v33 = vpack.c.bf16 %v1080_v31, %v1079_v32 }
 0x76c   :  { %1830 = vmatmul.mubr.bf16.vlgmr.msra.gmra.mrb[12].mxu1 %v1081_v33 }
 0x76d   :  { %1869 = vmatprep.mubr.msk.bf16.mxu1 %vm2082_vm0, %v2081_v0  ;;  %1854 = vmatpush3.bf16.msra.mxu1 %v1954_v20 }
 0x76e   :  { %1855 = vmatprep.subr.bf16.mxu1 %v2081_v0 }
 0x771   :  { %1856 = vmatpush3.bf16.msra.mxu1 %v1955_v21 }
 0x772   :  { %1857 = vmatprep.subr.bf16.mxu1 %v2081_v0 }
 0x775   :  { %1858 = vmatpush3.bf16.msra.mxu1 %v1956_v22 }
 0x776   :  { %1859 = vmatprep.subr.bf16.mxu1 %v2081_v0 }
 0x779   :  { %1860 = vmatpush3.bf16.msra.mxu1 %v1957_v23 }
 0x77a   :  { %1861 = vmatprep.subr.bf16.mxu1 %v2081_v0 }
 0x77d   :  { %1862 = vmatpush3.bf16.msra.mxu1 %v1958_v24 }
 0x77e   :  { %1863 = vmatprep.subr.bf16.mxu1 %v2081_v0 }
 0x781   :  { %1864 = vmatpush3.bf16.msra.mxu1 %v1959_v25 }
 0x782   :  { %1865 = vmatprep.subr.bf16.mxu1 %v2081_v0 }
 0x785   :  { %1866 = vmatpush3.bf16.msra.mxu1 %v1960_v26 }
 0x786   :  { %1867 = vmatprep.subr.bf16.mxu1 %v2081_v0 }
 0x789   :  { %1868 = vmatpush3.bf16.msra.mxu1 %v1961_v27 }
 0x83f   :  { %v1181_v43 = vpop.f32.mrb[12].mxu1 }
 0x840   :  { %v1831_v44 = vpop.f32.mrb[13].mxu1  ;;  %v1199_v46 = vmul.f32 %v1181_v43, %v1181_v43 }
 0x841   :  { %v1184_v45 = vpop.f32.mrb[14].mxu1 }
 0x842   :  { %v1191_v47 = vadd.f32 %v1184_v45, %v1181_v43  ;;  %v1200_v48 = vmul.f32 %v1184_v45, %v1184_v45  ;;  %v1832_v49 = vpop.f32.mrb[15].mxu1 }
 0x844   :  { %v1192_v50 = vrot.slane %v1191_v47, 4  ;;  %v1201_v51 = vadd.f32 %v1200_v48, %v1199_v46 }
 0x846   :  { %v1193_v52 = vadd.f32 %v1192_v50, %v1191_v47  ;;  %v1202_v53 = vrot.slane %v1201_v51, 4 }
 0x848   :  { %v1194_v54 = vrot.slane %v1193_v52, 2  ;;  %v1203_v55 = vadd.f32 %v1202_v53, %v1201_v51  ;;  %v1338_v53 = vld [vmem:[#allocation7 + $0x10] sm:$0x1] }
 0x84a   :  { %v1195_v56 = vadd.f32 %v1194_v54, %v1193_v52  ;;  %v1204_v57 = vrot.slane %v1203_v55, 2 }
 0x84c   :  { %v1196_v58 = vrot.slane %v1195_v56, 1  ;;  %v1205_v59 = vadd.f32 %v1204_v57, %v1203_v55 }
 0x84e   :  { %v1197_v60 = vadd.f32 %v1196_v58, %v1195_v56  ;;  %v1206_v61 = vrot.slane %v1205_v59, 1  ;;  %v1339_v56 = vld [vmem:[#allocation7 + $0x11] sm:$0x1] }
 0x850   :  { %v1198_v62 = vmul.f32 0.0625, %v1197_v60  ;;  %v1207_v63 = vadd.f32 %v1206_v61, %v1205_v59 }
 0x852   :  { %v1208_v1 = vmul.f32 0.0625, %v1207_v63  ;;  %v1209_v2 = vmul.f32 %v1198_v62, %v1198_v62 }
 0x854   :  { %v1210_v3 = vsub.f32 %v1208_v1, %v1209_v2 }
 0x856   :  { %v1211_v4 = vadd.f32 0.001, %v1210_v3 }
 0x858   :  { %1976 = vrsqrt.f32 %v1211_v4 }
 0x862   :  { %v1977_v6 = vpop.eup %1976 }
 0x863   :  { %v1213_v7 = vmul.f32 %v1977_v6, %v1189_v5  ;;  %v1586_v5 = vld [vmem:[#allocation7 + $0x12] ss:$0 sm:$0xff] }
 0x865   :  { %v1214_v9 = vmul.f32 %v1213_v7, %v1198_v62  ;;  %v1219_v10 = vrot.slane %v1213_v7, %v2175_v42 }
 0x867   :  { %v1215_v11 = vsub.f32 %v1190_v8, %v1214_v9  ;;  %v1220_v12 = vmul.f32 %v1219_v10, %v1181_v43  ;;  %v1221_v13 = vmul.f32 %v1219_v10, %v1184_v45 }
 0x869   :  { %v1225_v14 = vrot.slane %v1215_v11, %v2175_v42 }
 0x86b   :  { %v1226_v15 = vadd.f32 %v1225_v14, %v1220_v12  ;;  %v1227_v16 = vadd.f32 %v1225_v14, %v1221_v13 }
 0x86d   :  { %v1229_v17 = vmax.f32 %v1227_v16, 0.0  ;;  %v1228_v18 = vmax.f32 %v1226_v15, 0.0 }
 0x86f   :  { %v1230_v19 = vpack.c.bf16 %v1229_v17, %v1228_v18 }
 0x871   :  { %1850 = vmatmul.mubr.bf16.vlgmr.msra.gmra.mrb[16].mxu0 %v1230_v19 }
 0x944   :  { %v1330_v28 = vpop.f32.mrb[16].mxu0 }
 0x945   :  { %v1851_v29 = vpop.f32.mrb[17].mxu0  ;;  %v1348_v31 = vmul.f32 %v1330_v28, %v1330_v28 }
 0x946   :  { %v1333_v30 = vpop.f32.mrb[18].mxu0 }
 0x947   :  { %v1340_v32 = vadd.f32 %v1333_v30, %v1330_v28  ;;  %v1349_v33 = vmul.f32 %v1333_v30, %v1333_v30  ;;  %v1852_v34 = vpop.f32.mrb[19].mxu0 }
 0x949   :  { %v1341_v35 = vrot.slane %v1340_v32, 4  ;;  %v1350_v36 = vadd.f32 %v1349_v33, %v1348_v31 }
 0x94b   :  { %v1342_v37 = vadd.f32 %v1341_v35, %v1340_v32  ;;  %v1351_v38 = vrot.slane %v1350_v36, 4 }
 0x94d   :  { %v1343_v39 = vrot.slane %v1342_v37, 2  ;;  %v1352_v40 = vadd.f32 %v1351_v38, %v1350_v36 }
 0x94f   :  { %v1344_v41 = vadd.f32 %v1343_v39, %v1342_v37  ;;  %v1353_v43 = vrot.slane %v1352_v40, 2 }
 0x951   :  { %v1345_v44 = vrot.slane %v1344_v41, 1  ;;  %v1354_v45 = vadd.f32 %v1353_v43, %v1352_v40 }
 0x953   :  { %v1346_v0 = vadd.f32 %v1345_v44, %v1344_v41  ;;  %v1355_v46 = vrot.slane %v1354_v45, 1 }
 0x955   :  { %v1347_v47 = vmul.f32 0.0625, %v1346_v0  ;;  %v1356_v48 = vadd.f32 %v1355_v46, %v1354_v45 }
 0x957   :  { %v1357_v49 = vmul.f32 0.0625, %v1356_v48  ;;  %v1358_v50 = vmul.f32 %v1347_v47, %v1347_v47 }
 0x959   :  { %v1359_v51 = vsub.f32 %v1357_v49, %v1358_v50 }
 0x95b   :  { %v1360_v52 = vadd.f32 0.001, %v1359_v51 }
 0x95d   :  { %1978 = vrsqrt.f32 %v1360_v52 }
 0x967   :  { %v1979_v54 = vpop.eup %1978 }
 0x968   :  { %v1362_v55 = vmul.f32 %v1979_v54, %v1338_v53 }
 0x96a   :  { %v1363_v57 = vmul.f32 %v1362_v55, %v1347_v47  ;;  %v1368_v58 = vrot.slane %v1362_v55, %v2175_v42 }
 0x96c   :  { %v1364_v59 = vsub.f32 %v1339_v56, %v1363_v57  ;;  %v1369_v60 = vmul.f32 %v1368_v58, %v1330_v28  ;;  %v1370_v61 = vmul.f32 %v1368_v58, %v1333_v30 }
 0x96e   :  { %v1374_v62 = vrot.slane %v1364_v59, %v2175_v42 }
 0x970   :  { %v1375_v63 = vadd.f32 %v1374_v62, %v1369_v60  ;;  %v1376_v1 = vadd.f32 %v1374_v62, %v1370_v61 }
 0x972   :  { %v1378_v2 = vmax.f32 %v1376_v1, 0.0  ;;  %v1377_v3 = vmax.f32 %v1375_v63, 0.0 }
 0x974   :  { %v1379_v4 = vpack.c.bf16 %v1378_v2, %v1377_v3 }
 0x976   :  { %1870 = vmatmul.mubr.bf16.vlgmr.msra.gmra.mrb[16].mxu1 %v1379_v4 }
 0xa49   :  { %v1485_v6 = vpop.f32.mrb[16].mxu1 }
 0xa4a   :  { %v1486_v7 = vadd.f32 %v1586_v5, %v1485_v6  ;;  %v1871_v8 = vpop.f32.mrb[17].mxu1 }
 0xa4b   :  { %v1488_v9 = vpop.f32.mrb[18].mxu1 }
 0xa4c   :  { %1492 = vst.msk [vmem:[#allocation8] sm:$0xff] %vm98_vm1, %v1486_v7  ;;  %v1489_v10 = vadd.f32 %v1586_v5, %v1488_v9  ;;  %v1872_v11 = vpop.f32.mrb[19].mxu1 }
 0xa4e   :  { %1493 = vst.msk [vmem:[#allocation8 + $0x8] sm:$0xff] %vm98_vm1, %v1489_v10 }
 0xa4f   :  { %2057 = shalt.err (!%p2054_p0)
}
 0xa50   :  { %s2058_s8 = scalar_lea.hbm %s2294_s3, 256 }
 0xa51   :  { %p2059_p1 = scmp.ne.s32.totalorder %s2294_s3, %s2058_s8  ;;  %p2062_p2 = scmp.lt.u32.totalorder %s2058_s8, %s2294_s3 }
 0xa53   :  { %p2064_p3 = pnand %p2062_p2, %p2059_p1 }
 0xa55   :  { %2067 = shalt.err (!%p2064_p3)
}
 0xa56   :  { %s2084_s1 = smov 128   ;;  %s2085_s13 = smov 8  }
 0xa57   :  { %1505 = dma.vmem_to_hbm [thread:$0]  %s1500_s30, 256, %s2294_s3, [#allocation4], %s2084_s1, %s2084_s1, %s2085_s13  }
 0xa58   :  { %2072 = dma.done.wait [#allocation4], 256  }
 0xa59   :  { %2073 = vsyncadd [#allocation4], 4294967040 }
 0xa5a   :  { %1513 = vsyncpa [#allocation3], 1 }
 0xa5b   :  { %1514 = vsyncpa [#allocation6], 1 }
 0xa5c   :  { %1515 = vsyncpa [#allocation4], 1 }

</bundles_post_ra>
